<compile_context>
chip_gen: v7x
topology: tpu7x:2x2x1
jax: 0.10.0
libtpu: 0.0.40
codegen_flags: <defaults>
</compile_context>

<pallas_src>
import functools

import jax
import jax.numpy as jnp
from jax.experimental import pallas as pl
from jax.experimental.pallas import tpu as pltpu

LANE = 128   # TPU lane width: pad small output dims up to this.


def _round_up(x, m):
    return (x + m - 1) // m * m


def _choose_batch_block(batch):
    """Images per grid step.

    Keep >=2 grid steps whenever batch >= 2 so v7x's two TensorCores both get work
    (v5e/v6e pay one extra ~0.35us step, negligible); for larger batches use 16-image
    blocks so bf16 fc-head operands fill whole MXU sublane slabs (v6e/v7x).
    """
    if batch >= 32:
        return 16
    if batch >= 2:
        return pl.cdiv(batch, 2)
    return 1


def cnn_kernel(xp_ref, wc_ref, bc_ref, w1_ref, b1_ref, w2_ref, b2_ref, o_ref, *, bb, hw):
    """One batch-block of `bb` images per grid step.

    xp_ref : (bb*hw, K)   bf16  im2col patches for bb images (K = 9*Cin, UNPADDED)
    wc_ref : (K, Cpad)    bf16  3x3 conv weights as a single matmul operand
    bc_ref : (1, Cpad)    f32   conv bias (zero-padded columns)
    w1_ref : (Cpad, Hid)  f32   fc1 weights with the 1/(H*W) pooling scale folded in
    b1_ref : (1, Hid)     f32   fc1 bias
    w2_ref : (Hid, Npad)  f32   fc2 weights (zero-padded columns)
    b2_ref : (1, Npad)    f32   fc2 bias, padded columns = -1e30 (softmax mask)
    o_ref  : (bb, Npad)   f32   softmax probabilities (lane-dense store, no broadcast)
    """
    # --- synthetic base_model stem: 3x3 conv for the whole block as ONE bf16 MXU matmul ---
    conv = jnp.dot(xp_ref[...], wc_ref[...],
                   preferred_element_type=jnp.float32)               # (bb*hw, Cpad) f32
    feat = jnp.maximum(conv + bc_ref[...], 0.0)

    # --- global average pool as a batched reduction (XLU/VPU slot, off the MXU path);
    #     the 1/(H*W) scale is folded into w1 ---
    pooled = jnp.sum(feat.reshape(bb, hw, feat.shape[-1]), axis=1)   # (bb, Cpad)

    # --- fc head: Linear -> ReLU -> Dropout(eval: identity) -> Linear -> Softmax.
    #     Kept in f32 for parity with the PyTorch Linear layers (compute is negligible). ---
    h = jnp.dot(pooled, w1_ref[...], preferred_element_type=jnp.float32) + b1_ref[...]
    h = jnp.maximum(h, 0.0)                                          # (bb, Hid)
    logits = jnp.dot(h, w2_ref[...], preferred_element_type=jnp.float32) + b2_ref[...]

    # exact softmax; padded logit columns carry a -1e30 bias -> probability exactly 0
    m = jnp.max(logits, axis=1, keepdims=True)
    e = jnp.exp(logits - m)
    o_ref[...] = (e / jnp.sum(e, axis=1, keepdims=True)).astype(o_ref.dtype)


def stage_params(params, image_hw, num_classes):
    """One-time weight staging (pad / cast / GAP-scale fold).

    Call at model-load time; the staged tensors are reused by every forward pass so the
    ~0.6 MB of pad/cast XLA ops are not re-run per call.
    """
    wc, bc, w1, b1, w2, b2 = params
    H, W = image_hw
    HW = H * W
    kh, kw, cin, cf = wc.shape
    K = kh * kw * cin
    Cpad = _round_up(cf, LANE)
    Npad = _round_up(num_classes, LANE)

    wc_p = jnp.pad(wc.reshape(K, cf), ((0, 0), (0, Cpad - cf))).astype(jnp.bfloat16)
    bc_p = jnp.pad(bc, ((0, 0), (0, Cpad - cf)))                              # f32
    w1_p = jnp.pad(w1 / float(HW), ((0, Cpad - cf), (0, 0)))                  # f32, fold 1/(H*W)
    b1_p = b1                                                                 # (1, Hid) f32
    w2_p = jnp.pad(w2, ((0, 0), (0, Npad - num_classes)))                     # f32
    b2_p = jnp.pad(b2, ((0, 0), (0, Npad - num_classes)), constant_values=-1e30)
    return (wc_p, bc_p, w1_p, b1_p, w2_p, b2_p)


@functools.partial(jax.jit, static_argnames=("num_classes",))
def cnn_forward(x_nchw, staged, num_classes):
    """x_nchw: (B, Cin, H, W) float32 (PyTorch NCHW). `staged` comes from stage_params()."""
    wc_p, bc_p, w1_p, b1_p, w2_p, b2_p = staged
    B, Cin, H, W = x_nchw.shape
    HW = H * W
    K = 9 * Cin                       # == wc_p.shape[0]
    Cpad = wc_p.shape[-1]
    Hid = w1_p.shape[-1]
    Npad = w2_p.shape[-1]

    bb = _choose_batch_block(B)
    G = pl.cdiv(B, bb)
    Bpad = G * bb

    # --- glue: NCHW -> NHWC, zero-pad, im2col patch matrix; K stays UNPADDED (36) so the
    #     streamed patch bytes are not inflated 128/36x (most important on v5e's HBM BW) ---
    x_nhwc = jnp.transpose(x_nchw, (0, 2, 3, 1))
    x_p = jnp.pad(x_nhwc, ((0, 0), (1, 1), (1, 1), (0, 0)))
    taps = [x_p[:, di:di + H, dj:dj + W, :] for di in range(3) for dj in range(3)]
    patches = jnp.stack(taps, axis=3).reshape(B, HW, K).astype(jnp.bfloat16)
    if Bpad != B:
        patches = jnp.pad(patches, ((0, Bpad - B), (0, 0), (0, 0)))
    patches = patches.reshape(G, bb * HW, K)        # one lane/sublane-clean block per grid step

    kernel = functools.partial(cnn_kernel, bb=bb, hw=HW)
    out = pl.pallas_call(
        kernel,
        out_shape=jax.ShapeDtypeStruct((G, bb, Npad), jnp.float32),
        grid=(G,),
        in_specs=[
            pl.BlockSpec((None, bb * HW, K), lambda g: (g, 0, 0)),   # per-step patch block
            pl.BlockSpec((K, Cpad), lambda g: (0, 0)),               # grid-invariant weights
            pl.BlockSpec((1, Cpad), lambda g: (0, 0)),
            pl.BlockSpec((Cpad, Hid), lambda g: (0, 0)),
            pl.BlockSpec((1, Hid), lambda g: (0, 0)),
            pl.BlockSpec((Hid, Npad), lambda g: (0, 0)),
            pl.BlockSpec((1, Npad), lambda g: (0, 0)),
        ],
        out_specs=pl.BlockSpec((None, bb, Npad), lambda g: (g, 0, 0)),
        compiler_params=pltpu.CompilerParams(
            dimension_semantics=("parallel",),       # megacore split over batch blocks (v7x)
        ),
    )(patches, wc_p, bc_p, w1_p, b1_p, w2_p, b2_p)

    # lane-dense padded output -> user-visible (B, num_classes)
    return out.reshape(Bpad, Npad)[:B, :num_classes]


def init_params(key, cin, in_features, hidden, num_classes):
    """Deterministic synthetic parameters (no checkpoint load)."""
    k = jax.random.split(key, 6)
    wc = jax.random.normal(k[0], (3, 3, cin, in_features), jnp.float32) * 0.1
    bc = jax.random.normal(k[1], (1, in_features), jnp.float32) * 0.01
    w1 = jax.random.normal(k[2], (in_features, hidden), jnp.float32) * 0.05
    b1 = jax.random.normal(k[3], (1, hidden), jnp.float32) * 0.01
    w2 = jax.random.normal(k[4], (hidden, num_classes), jnp.float32) * 0.05
    b2 = jax.random.normal(k[5], (1, num_classes), jnp.float32) * 0.01
    return (wc, bc, w1, b1, w2, b2)


if __name__ == "__main__":
    B, Cin, H, W = 2, 4, 16, 16          # small NCHW input
    in_features = 8                       # base_model.fc.in_features (synthetic)
    hidden = 1024                         # nn.Linear(in_features, 1024)
    num_classes = 5

    key = jax.random.PRNGKey(0)
    kx, kp = jax.random.split(key)
    x = jax.random.normal(kx, (B, Cin, H, W), jnp.float32)
    params = init_params(kp, Cin, in_features, hidden, num_classes)

    # one-time weight staging (model-load time), hoisted out of the per-call path
    staged = stage_params(params, (H, W), num_classes)

    probs = cnn_forward(x, staged, num_classes)
    probs = jax.block_until_ready(probs)

    assert probs.shape == (B, num_classes)
    # exact softmax divide -> rows sum to 1 within f32 rounding
    assert bool(jnp.all(jnp.abs(jnp.sum(probs, axis=1) - 1.0) < 1e-4))
    print("KERNEL_OK")
</pallas_src>

<mosaic_0001>
module attributes {stable_mosaic.version = 11 : i64} {
  func.func @cnn_kernel(%arg0: i32, %arg1: memref<1x256x36xbf16, #tpu.memory_space<vmem>>, %arg2: memref<36x128xbf16, #tpu.memory_space<vmem>>, %arg3: memref<1x128xf32, #tpu.memory_space<vmem>>, %arg4: memref<128x1024xf32, #tpu.memory_space<vmem>>, %arg5: memref<1x1024xf32, #tpu.memory_space<vmem>>, %arg6: memref<1024x128xf32, #tpu.memory_space<vmem>>, %arg7: memref<1x128xf32, #tpu.memory_space<vmem>>, %arg8: memref<1x1x128xf32, #tpu.memory_space<vmem>>) attributes {dimension_semantics = [#tpu.dimension_semantics<parallel>], iteration_bounds = array<i64: 2>, scalar_prefetch = 0 : i64, scratch_operands = 0 : i64, tpu.core_type = #tpu.core_type<tc>, window_params = [{transform_indices = @transform_0, window_bounds = array<i64: 1, 256, 36>}, {pipeline_mode = #tpu.pipeline_mode<synchronous>, transform_indices = @transform_1, window_bounds = array<i64: 36, 128>}, {pipeline_mode = #tpu.pipeline_mode<synchronous>, transform_indices = @transform_2, window_bounds = array<i64: 1, 128>}, {pipeline_mode = #tpu.pipeline_mode<synchronous>, transform_indices = @transform_3, window_bounds = array<i64: 128, 1024>}, {pipeline_mode = #tpu.pipeline_mode<synchronous>, transform_indices = @transform_4, window_bounds = array<i64: 1, 1024>}, {pipeline_mode = #tpu.pipeline_mode<synchronous>, transform_indices = @transform_5, window_bounds = array<i64: 1024, 128>}, {pipeline_mode = #tpu.pipeline_mode<synchronous>, transform_indices = @transform_6, window_bounds = array<i64: 1, 128>}, {transform_indices = @transform_7, window_bounds = array<i64: 1, 1, 128>}]} {
    %c0 = arith.constant 0 : index
    %c0_0 = arith.constant 0 : index
    %c0_1 = arith.constant 0 : index
    %0 = vector.load %arg1[%c0, %c0_0, %c0_1] : memref<1x256x36xbf16, #tpu.memory_space<vmem>>, vector<1x256x36xbf16>
    %1 = vector.shape_cast %0 : vector<1x256x36xbf16> to vector<256x36xbf16>
    %c0_2 = arith.constant 0 : index
    %c0_3 = arith.constant 0 : index
    %2 = vector.load %arg2[%c0_2, %c0_3] : memref<36x128xbf16, #tpu.memory_space<vmem>>, vector<36x128xbf16>
    %cst = arith.constant dense<0.000000e+00> : vector<256x128xf32>
    %3 = tpu.matmul %1, %2, %cst {dimension_numbers = #tpu.dot_dimension_numbers<[1], [0], [0], [1], [0, 0, 1, 1], [], []>} : vector<256x36xbf16>, vector<36x128xbf16>, vector<256x128xf32> -> vector<256x128xf32>
    %c0_4 = arith.constant 0 : index
    %c0_5 = arith.constant 0 : index
    %4 = vector.load %arg3[%c0_4, %c0_5] : memref<1x128xf32, #tpu.memory_space<vmem>>, vector<1x128xf32>
    %5 = vector.broadcast %4 : vector<1x128xf32> to vector<256x128xf32>
    %6 = arith.addf %3, %5 : vector<256x128xf32>
    %cst_6 = arith.constant 0.000000e+00 : f32
    %7 = vector.broadcast %cst_6 : f32 to vector<256x128xf32>
    %8 = arith.maximumf %6, %7 : vector<256x128xf32>
    %9 = vector.shape_cast %8 : vector<256x128xf32> to vector<1x256x128xf32>
    %cst_7 = arith.constant dense<0.000000e+00> : vector<1x128xf32>
    %10 = vector.multi_reduction <add>, %9, %cst_7 [1] : vector<1x256x128xf32> to vector<1x128xf32>
    %c0_8 = arith.constant 0 : index
    %c0_9 = arith.constant 0 : index
    %11 = vector.load %arg4[%c0_8, %c0_9] : memref<128x1024xf32, #tpu.memory_space<vmem>>, vector<128x1024xf32>
    %cst_10 = arith.constant dense<0.000000e+00> : vector<1x1024xf32>
    %12 = tpu.matmul %10, %11, %cst_10 {dimension_numbers = #tpu.dot_dimension_numbers<[1], [0], [0], [1], [0, 0, 1, 1], [], []>} : vector<1x128xf32>, vector<128x1024xf32>, vector<1x1024xf32> -> vector<1x1024xf32>
    %c0_11 = arith.constant 0 : index
    %c0_12 = arith.constant 0 : index
    %13 = vector.load %arg5[%c0_11, %c0_12] : memref<1x1024xf32, #tpu.memory_space<vmem>>, vector<1x1024xf32>
    %14 = arith.addf %12, %13 : vector<1x1024xf32>
    %cst_13 = arith.constant 0.000000e+00 : f32
    %15 = vector.broadcast %cst_13 : f32 to vector<1x1024xf32>
    %16 = arith.maximumf %14, %15 : vector<1x1024xf32>
    %c0_14 = arith.constant 0 : index
    %c0_15 = arith.constant 0 : index
    %17 = vector.load %arg6[%c0_14, %c0_15] : memref<1024x128xf32, #tpu.memory_space<vmem>>, vector<1024x128xf32>
    %cst_16 = arith.constant dense<0.000000e+00> : vector<1x128xf32>
    %18 = tpu.matmul %16, %17, %cst_16 {dimension_numbers = #tpu.dot_dimension_numbers<[1], [0], [0], [1], [0, 0, 1, 1], [], []>} : vector<1x1024xf32>, vector<1024x128xf32>, vector<1x128xf32> -> vector<1x128xf32>
    %c0_17 = arith.constant 0 : index
    %c0_18 = arith.constant 0 : index
    %19 = vector.load %arg7[%c0_17, %c0_18] : memref<1x128xf32, #tpu.memory_space<vmem>>, vector<1x128xf32>
    %20 = arith.addf %18, %19 : vector<1x128xf32>
    %cst_19 = arith.constant dense<0xFF800000> : vector<1xf32>
    %21 = vector.multi_reduction <maximumf>, %20, %cst_19 [1] : vector<1x128xf32> to vector<1xf32>
    %22 = vector.shape_cast %21 : vector<1xf32> to vector<1x1xf32>
    %23 = vector.broadcast %22 : vector<1x1xf32> to vector<1x128xf32>
    %24 = arith.subf %20, %23 : vector<1x128xf32>
    %25 = math.exp %24 : vector<1x128xf32>
    %cst_20 = arith.constant dense<0.000000e+00> : vector<1xf32>
    %26 = vector.multi_reduction <add>, %25, %cst_20 [1] : vector<1x128xf32> to vector<1xf32>
    %27 = vector.shape_cast %26 : vector<1xf32> to vector<1x1xf32>
    %28 = vector.broadcast %27 : vector<1x1xf32> to vector<1x128xf32>
    %29 = arith.divf %25, %28 : vector<1x128xf32>
    %c0_21 = arith.constant 0 : index
    %c0_22 = arith.constant 0 : index
    %c0_23 = arith.constant 0 : index
    %30 = vector.load %arg8[%c0_21, %c0_22, %c0_23] : memref<1x1x128xf32, #tpu.memory_space<vmem>>, vector<1x1x128xf32>
    %31 = vector.shape_cast %30 : vector<1x1x128xf32> to vector<1x128xf32>
    %32 = vector.shape_cast %29 : vector<1x128xf32> to vector<1x1x128xf32>
    tpu.vector_store %arg8[%c0_21, %c0_22, %c0_23], %32 {strides = array<i32>} : memref<1x1x128xf32, #tpu.memory_space<vmem>>, vector<1x1x128xf32>,
    return
  }
  func.func @transform_0(%arg0: i32) -> (i32, i32, i32) {
    %c0_i32 = arith.constant 0 : i32
    %c0_i32_0 = arith.constant 0 : i32
    %c0_i32_1 = arith.constant 0 : i32
    return %arg0, %c0_i32, %c0_i32_0 : i32, i32, i32
  }
  func.func @transform_1(%arg0: i32) -> (i32, i32) {
    %c0_i32 = arith.constant 0 : i32
    %c0_i32_0 = arith.constant 0 : i32
    %c0_i32_1 = arith.constant 0 : i32
    return %c0_i32, %c0_i32_0 : i32, i32
  }
  func.func @transform_2(%arg0: i32) -> (i32, i32) {
    %c0_i32 = arith.constant 0 : i32
    %c0_i32_0 = arith.constant 0 : i32
    %c0_i32_1 = arith.constant 0 : i32
    return %c0_i32, %c0_i32_0 : i32, i32
  }
  func.func @transform_3(%arg0: i32) -> (i32, i32) {
    %c0_i32 = arith.constant 0 : i32
    %c0_i32_0 = arith.constant 0 : i32
    %c0_i32_1 = arith.constant 0 : i32
    return %c0_i32, %c0_i32_0 : i32, i32
  }
  func.func @transform_4(%arg0: i32) -> (i32, i32) {
    %c0_i32 = arith.constant 0 : i32
    %c0_i32_0 = arith.constant 0 : i32
    %c0_i32_1 = arith.constant 0 : i32
    return %c0_i32, %c0_i32_0 : i32, i32
  }
  func.func @transform_5(%arg0: i32) -> (i32, i32) {
    %c0_i32 = arith.constant 0 : i32
    %c0_i32_0 = arith.constant 0 : i32
    %c0_i32_1 = arith.constant 0 : i32
    return %c0_i32, %c0_i32_0 : i32, i32
  }
  func.func @transform_6(%arg0: i32) -> (i32, i32) {
    %c0_i32 = arith.constant 0 : i32
    %c0_i32_0 = arith.constant 0 : i32
    %c0_i32_1 = arith.constant 0 : i32
    return %c0_i32, %c0_i32_0 : i32, i32
  }
  func.func @transform_7(%arg0: i32) -> (i32, i32, i32) {
    %c0_i32 = arith.constant 0 : i32
    %c0_i32_0 = arith.constant 0 : i32
    %c0_i32_1 = arith.constant 0 : i32
    return %arg0, %c0_i32, %c0_i32_0 : i32, i32, i32
  }
}

</mosaic_0001>

<bundles_post_ra>
// kernel: cnn_forward.1
= control target key start
LH: loop header
LB: loop body
LE: loop exit
PB: predicated region body
PF: predicated region fallthrough
CT: control target
= control target key end

     0   :  { %12 = vsyncpa [#allocation3], 0  ;;  %s3307_s0 = inlined_call_operand.vmem [shape: bf16[2,256,36], index: 0, kind: input, shape index: {}]   ;;  %s3308_s1 = inlined_call_operand.vmem [shape: bf16[36,128], index: 1, kind: input, shape index: {}]   ;;  %s3309_s2 = inlined_call_operand.vmem [shape: f32[1,128], index: 2, kind: input, shape index: {}]   ;;  %s3310_s3 = inlined_call_operand.vmem [shape: f32[128,1024], index: 3, kind: input, shape index: {}]   ;;  %s3311_s4 = inlined_call_operand.vmem [shape: f32[1,1024], index: 4, kind: input, shape index: {}]   ;;  %s3312_s5 = inlined_call_operand.vmem [shape: f32[1024,128], index: 5, kind: input, shape index: {}]   ;;  %s3313_s6 = inlined_call_operand.vmem [shape: f32[1,128], index: 6, kind: input, shape index: {}]   ;;  %s3314_s7 = inlined_call_operand.hbm [shape: f32[2,1,128], index: 7, kind: output, shape index: {}]  }
   0x1   :  { %14 = vsyncpa [#allocation3 + $0x1], 0  ;;  %s2320_s24 = smov 0   ;;  %s2322_s25 = smov 0  }
   0x2   :  { %s2324_s26 = smov 0   ;;  %s2326_s27 = smov 0  }
   0x3 LB: > { %s2341_s28 = sadd.s32 4294967295, %s2276_s27   ;;  %s1651_s29 = sadd.s32 4294967294, %s2276_s27   ;;  %s2276_s27 = sphi %s2326_s27, %s3320_s27   ;;  %s2272_s26 = sphi %s2324_s26, %s3319_s26   ;;  %s2268_s25 = sphi %s2322_s25, %s3318_s25   ;;  %s2264_s24 = sphi %s2320_s24, %s3317_s24  }
   0x4   : > { %s2345_s30 = sadd.s32 1, %s2276_s27   ;;  %s179_s8 = sadd.s32 1, %s2272_s26 }
   0x5   : > { %s176_s9 = ssub.s32 %s2276_s27, %s2345_s30  ;;  %p189_p0 = scmp.ne.s32.totalorder %s2272_s26, %s2268_s25 }
   0x6   : > { %p177_p1 = scmp.eq.s32.totalorder %s176_s9, 0  ;;  %p190_p2 = scmp.eq.s32.totalorder %s2341_s28, 1 }
   0x7   : > { %p195_p3 = scmp.ne.s32.totalorder %s2268_s25, %s2264_s24  ;;  %p196_p4 = scmp.eq.s32.totalorder %s1651_s29, 1 }
   0x8   : > { %s2356_s10 = scalar_select %p177_p1, %s2272_s26, %s179_s8  }
   0x9   : > { %p2358_p5 = por %p190_p2, %p189_p0  ;;  %p2362_p6 = por %p196_p4, %p195_p3 }
   0xa   : > { %p1654_p7 = scmp.ge.s32.totalorder %s2276_s27, 1  ;;  %p240_p8 = scmp.lt.s32.totalorder %s2276_s27, 3 }
   0xc   : > { %p241_p9 = pnand %p1654_p7, %p240_p8 }
   0xd   : > { %v2191_v0 = vld [vmem:[%s3308_s1] sm:$0xff] (!%p241_p9)   ;;  %v2192_v1 = vld [vmem:[%s3308_s1 + $0x8] sm:$0xff] (!%p241_p9)   ;;  %p271_p10 = scmp.lt.s32.totalorder (!%p241_p9), %s2341_s28, 1  ;;  %v2193_v2 = vld [vmem:[%s3308_s1 + $0x10] ss:$0 sps:$4 sm:$0x33] (!%p241_p9)  }
   0xe   : > { %244 = sbr.rel (%p241_p9) target bundleno = 1147 (0x47b), region = 48  ;;  %1856 = vmatprep.subr.bf16.mxu0 (!%p241_p9), %v2191_v0  ;;  %vm465_vm0 = vcmask (!%p241_p9), 1041408   ;;  %vm416_vm1 = vcmask (!%p241_p9), 293888   ;;  %v700_v20 = vld [vmem:[%s3310_s3 + $0x8] sm:$0xff] (!%p241_p9)  ;;  %v699_v23 = vld [vmem:[%s3310_s3] sm:$0xff] (!%p241_p9)  ;;  %vm1570_vm2 = vcmask (!%p241_p9), 1040384  }
   0xf   : > { %1857 = vmatpush3.bf16.msra.mxu0 (!%p241_p9), %v2191_v0  ;;  %v467_v4 = vsel (!%p241_p9), %vm465_vm0, %v2193_v2, 0  ;;  %v708_v21 = vld [vmem:[%s3310_s3 + $0x48] sm:$0xff] (!%p241_p9)  ;;  %v707_v24 = vld [vmem:[%s3310_s3 + $0x40] sm:$0xff] (!%p241_p9)  ;;  %s269_s29 = sand.u32 (!%p241_p9), 1, %s2268_s25   ;;  %s1693_s8 = sshll.u32 (!%p241_p9), %s2341_s28, 4 }
  0x10   : > { %1858 = vmatprep.subr.bf16.mxu0 (!%p241_p9), %v2192_v1  ;;  %v1894_v22 = vpack.c.bf16 (!%p241_p9), %v708_v21, %v700_v20  ;;  %v704_v25 = vld [vmem:[%s3310_s3 + $0x28] sm:$0xff] (!%p241_p9)  ;;  %v1896_v26 = vpack.c.bf16 (!%p241_p9), %v707_v24, %v699_v23  ;;  %v703_v28 = vld [vmem:[%s3310_s3 + $0x20] sm:$0xff] (!%p241_p9)  ;;  %s270_s9 = scalar_lea.vmem (!%p241_p9), [#allocation2], %s269_s29  ;;  %s3265_s16 = scalar_lea.hbm (!%p241_p9), %s3314_s7, %s1693_s8 }
  0x11   : > { %v712_v27 = vld [vmem:[%s3310_s3 + $0x68] sm:$0xff] (!%p241_p9)  ;;  %v711_v29 = vld [vmem:[%s3310_s3 + $0x60] sm:$0xff] (!%p241_p9)  ;;  %s1596_s13 = sshll.u32 (!%p241_p9), %s270_s9, 4  ;;  %s3267_s13 = int_to_ptr.vmem [resolvable:$true] %s1596_s13 }
  0x12   : > { %1895 = vmatprep.subr.bf16.mxu1 (!%p241_p9), %v1894_v22  ;;  %v1958_v30 = vpack.c.bf16 (!%p241_p9), %v712_v27, %v704_v25  ;;  %v1960_v31 = vpack.c.bf16 (!%p241_p9), %v711_v29, %v703_v28  ;;  %v716_v32 = vld [vmem:[%s3310_s3 + $0x88] sm:$0xff] (!%p241_p9)  ;;  %v715_v35 = vld [vmem:[%s3310_s3 + $0x80] sm:$0xff] (!%p241_p9)  ;;  %s2214_s18 = scalar_lea.vmem (!%p241_p9), %s3267_s13, 16 }
  0x13   : > { %1859 = vmatpush3.bf16.msra.mxu0 (!%p241_p9), %v2192_v1  ;;  %1897 = vmatpush1.bf16.msra.mxu1 (!%p241_p9), %v1896_v26  ;;  %v724_v33 = vld [vmem:[%s3310_s3 + $0xc8] sm:$0xff] (!%p241_p9)  ;;  %v723_v36 = vld [vmem:[%s3310_s3 + $0xc0] sm:$0xff] (!%p241_p9)  ;;  %p2215_p11 = scmp.ne.s32.totalorder (!%p241_p9), %s3267_s13, %s2214_s18 }
  0x14   : > { %2150 = vmatprep.subr.msk.bf16.mxu0 (!%p241_p9), %vm465_vm0, %v2193_v2  ;;  %v1898_v34 = vpack.c.bf16 (!%p241_p9), %v724_v33, %v716_v32  ;;  %v720_v37 = vld [vmem:[%s3310_s3 + $0xa8] sm:$0xff] (!%p241_p9)  ;;  %v1900_v38 = vpack.c.bf16 (!%p241_p9), %v723_v36, %v715_v35  ;;  %v719_v40 = vld [vmem:[%s3310_s3 + $0xa0] sm:$0xff] (!%p241_p9) }
  0x15   : > { %s272_s17 = scalar_select %p271_p10, %s2341_s28, 1  ;;  %v728_v39 = vld [vmem:[%s3310_s3 + $0xe8] sm:$0xff]  ;;  %v727_v41 = vld [vmem:[%s3310_s3 + $0xe0] sm:$0xff] }
  0x16   : > { %1899 = vmatprep.subr.bf16.mxu1 %v1898_v34  ;;  %v1962_v42 = vpack.c.bf16 %v728_v39, %v720_v37  ;;  %v1964_v43 = vpack.c.bf16 %v727_v41, %v719_v40  ;;  %v732_v44 = vld [vmem:[%s3310_s3 + $0x108] sm:$0xff]  ;;  %v731_v47 = vld [vmem:[%s3310_s3 + $0x100] sm:$0xff]  ;;  %p2216_p12 = pnand %p2215_p11, %p2358_p5  ;;  %s2279_s28 = smov [#allocation2]  }
  0x17   : > { %s1696_s20 = sshll.u32 %s272_s17, 7  ;;  %1861 = vmatpush3.bf16.msra.mxu0 %v467_v4  ;;  %1901 = vmatpush1.bf16.msra.mxu1 %v1900_v38  ;;  %v740_v45 = vld [vmem:[%s3310_s3 + $0x148] sm:$0xff]  ;;  %v739_v48 = vld [vmem:[%s3310_s3 + $0x140] sm:$0xff]  ;;  %s1584_s17 = scalar_lea.sflag [#allocation3], %s269_s29 }
  0x18   : > { %s2382_s23 = scalar_lea.vmem %s3307_s0, %s1696_s20  ;;  %1959 = vmatprep.subr.bf16.mxu0 %v1958_v30  ;;  %v1902_v46 = vpack.c.bf16 %v740_v45, %v732_v44  ;;  %v736_v49 = vld [vmem:[%s3310_s3 + $0x128] sm:$0xff]  ;;  %v1904_v50 = vpack.c.bf16 %v739_v48, %v731_v47  ;;  %v735_v52 = vld [vmem:[%s3310_s3 + $0x120] sm:$0xff]  ;;  %v2278_v47 = vmov 0.0   ;;  %p2217_p13 = pneg %p2216_p12 }
  0x19   : > { %v2194_v3 = vld [vmem:[%s2382_s23] sm:$0xff]   ;;  %v2195_v5 = vld [vmem:[%s2382_s23 + $0x8] sm:$0xff]   ;;  %v2196_v6 = vld [vmem:[%s2382_s23 + $0x10] sm:$0xff]   ;;  %933 = vmatprep.mubr.f32.mxu1 %v2278_v47  ;;  %s2218_s19 = sshll.u32 %s2279_s28, 4  ;;  %s2219_s19 = int_to_ptr.vmem [resolvable:$false] %s2218_s19 }
  0x1a   : > { %1862 = vmatprep.mubr.msk.bf16.mxu0 %vm416_vm1, %v2194_v3  ;;  %v2197_v7 = vld [vmem:[%s2382_s23 + $0x18] sm:$0xff]   ;;  %v2198_v8 = vld [vmem:[%s2382_s23 + $0x20] sm:$0xff]   ;;  %v2199_v9 = vld [vmem:[%s2382_s23 + $0x28] sm:$0xff]   ;;  %1903 = vmatprep.subr.bf16.mxu1 %v1902_v46  ;;  %s2220_s20 = scalar_lea.vmem %s2219_s19, 32  ;;  %p2221_p0 = scmp.lt.s32.totalorder %s3267_s13, %s2219_s19 }
  0x1b   : > { %1863 = vmatmul.mubr.msk.bf16.vlgmr.msra.gmra.mrb[0].mxu0 %vm416_vm1, %v2195_v5  ;;  %v2200_v10 = vld [vmem:[%s2382_s23 + $0x30] sm:$0xff]   ;;  %v2201_v11 = vld [vmem:[%s2382_s23 + $0x38] sm:$0xff]   ;;  %v2202_v12 = vld [vmem:[%s2382_s23 + $0x40] sm:$0xff]   ;;  %1905 = vmatpush1.bf16.msra.mxu1 %v1904_v50  ;;  %p2222_p1 = scmp.lt.s32.totalorder %s2220_s20, %s2214_s18 }
  0x1c   : > { %1866 = vmatprep.mubr.msk.bf16.mxu0 %vm416_vm1, %v2196_v6  ;;  %v2203_v13 = vld [vmem:[%s2382_s23 + $0x48] sm:$0xff]   ;;  %v2204_v14 = vld [vmem:[%s2382_s23 + $0x50] sm:$0xff]   ;;  %v2205_v15 = vld [vmem:[%s2382_s23 + $0x58] sm:$0xff]   ;;  %1961 = vmatpush1.bf16.msra.mxu0 %v1960_v31 }
  0x1d   : > { %v2206_v16 = vld [vmem:[%s2382_s23 + $0x60] sm:$0xff]   ;;  %v2207_v17 = vld [vmem:[%s2382_s23 + $0x68] sm:$0xff]   ;;  %v2208_v18 = vld [vmem:[%s2382_s23 + $0x70] sm:$0xff]   ;;  %1963 = vmatprep.subr.bf16.mxu0 %v1962_v42  ;;  %p2223_p2 = por %p2222_p1, %p2221_p0 }
  0x1e   : > { %v2209_v19 = vld [vmem:[%s2382_s23 + $0x78] sm:$0xff]   ;;  %v744_v51 = vld [vmem:[%s3310_s3 + $0x168] sm:$0xff]  ;;  %v743_v53 = vld [vmem:[%s3310_s3 + $0x160] sm:$0xff] }
  0x1f   : > { %v1966_v54 = vpack.c.bf16 %v744_v51, %v736_v49  ;;  %v1968_v55 = vpack.c.bf16 %v743_v53, %v735_v52  ;;  %v748_v56 = vld [vmem:[%s3310_s3 + $0x188] sm:$0xff]  ;;  %v747_v59 = vld [vmem:[%s3310_s3 + $0x180] sm:$0xff]  ;;  %v702_v52 = vld [vmem:[%s3310_s3 + $0x18] sm:$0xff]  ;;  %p2224_p3 = pnand %p2223_p2, %p2217_p13 }
  0x20   : > { %1965 = vmatpush1.bf16.msra.mxu0 %v1964_v43  ;;  %v756_v57 = vld [vmem:[%s3310_s3 + $0x1c8] sm:$0xff]  ;;  %v755_v60 = vld [vmem:[%s3310_s3 + $0x1c0] sm:$0xff] }
  0x21   : > { %1967 = vmatprep.subr.bf16.mxu0 %v1966_v54  ;;  %v1906_v58 = vpack.c.bf16 %v756_v57, %v748_v56  ;;  %v752_v61 = vld [vmem:[%s3310_s3 + $0x1a8] sm:$0xff]  ;;  %v1908_v62 = vpack.c.bf16 %v755_v60, %v747_v59  ;;  %v751_v0 = vld [vmem:[%s3310_s3 + $0x1a0] sm:$0xff]  ;;  %v710_v54 = vld [vmem:[%s3310_s3 + $0x58] sm:$0xff] }
  0x22   : > { %v760_v63 = vld [vmem:[%s3310_s3 + $0x1e8] sm:$0xff]  ;;  %v759_v1 = vld [vmem:[%s3310_s3 + $0x1e0] sm:$0xff] }
  0x23   : > { %1867 = vmatmul.mubr.msk.bf16.gmra.mrb[4].mxu0 %vm416_vm1, %v2197_v7  ;;  %1907 = vmatprep.subr.bf16.mxu1 %v1906_v58  ;;  %v1970_v2 = vpack.c.bf16 %v760_v63, %v752_v61  ;;  %v1972_v3 = vpack.c.bf16 %v759_v1, %v751_v0  ;;  %v764_v4 = vld [vmem:[%s3310_s3 + $0x208] sm:$0xff]  ;;  %v763_v7 = vld [vmem:[%s3310_s3 + $0x200] sm:$0xff] }
  0x24   : > { %1870 = vmatprep.mubr.msk.bf16.mxu0 %vm416_vm1, %v2198_v8  ;;  %1969 = vmatpush1.bf16.msra.mxu0 %v1968_v55  ;;  %v772_v5 = vld [vmem:[%s3310_s3 + $0x248] sm:$0xff]  ;;  %v771_v8 = vld [vmem:[%s3310_s3 + $0x240] sm:$0xff]  ;;  %v1926_v55 = vpack.c.bf16 %v710_v54, %v702_v52 }
  0x25   : > { %1909 = vmatpush1.bf16.msra.mxu1 %v1908_v62  ;;  %1971 = vmatprep.subr.bf16.mxu0 %v1970_v2  ;;  %v1910_v6 = vpack.c.bf16 %v772_v5, %v764_v4  ;;  %v787_v20 = vld [vmem:[%s3310_s3 + $0x2c0] sm:$0xff]  ;;  %v784_v21 = vld [vmem:[%s3310_s3 + $0x2a8] sm:$0xff] }
  0x26   : > { %v792_v23 = vld [vmem:[%s3310_s3 + $0x2e8] sm:$0xff]  ;;  %v783_v24 = vld [vmem:[%s3310_s3 + $0x2a0] sm:$0xff] }
  0x27   : > { %1911 = vmatprep.subr.bf16.mxu1 %v1910_v6  ;;  %v791_v25 = vld [vmem:[%s3310_s3 + $0x2e0] sm:$0xff]  ;;  %v1978_v26 = vpack.c.bf16 %v792_v23, %v784_v21  ;;  %v796_v28 = vld [vmem:[%s3310_s3 + $0x308] sm:$0xff] }
  0x28   : > { %1973 = vmatpush1.bf16.msra.mxu0 %v1972_v3  ;;  %v1980_v27 = vpack.c.bf16 %v791_v25, %v783_v24  ;;  %v804_v29 = vld [vmem:[%s3310_s3 + $0x348] sm:$0xff]  ;;  %v795_v31 = vld [vmem:[%s3310_s3 + $0x300] sm:$0xff] }
  0x29   : > { %v1918_v30 = vpack.c.bf16 %v804_v29, %v796_v28  ;;  %v803_v32 = vld [vmem:[%s3310_s3 + $0x340] sm:$0xff]  ;;  %v800_v33 = vld [vmem:[%s3310_s3 + $0x328] sm:$0xff] }
  0x2a   : > { %v1920_v34 = vpack.c.bf16 %v803_v32, %v795_v31  ;;  %v808_v35 = vld [vmem:[%s3310_s3 + $0x368] sm:$0xff]  ;;  %v799_v36 = vld [vmem:[%s3310_s3 + $0x320] sm:$0xff] }
  0x2b   : > { %1871 = vmatmul.mubr.msk.bf16.gmra.mrb[8].mxu0 %vm416_vm1, %v2199_v9  ;;  %v768_v9 = vld [vmem:[%s3310_s3 + $0x228] sm:$0xff]  ;;  %v807_v37 = vld [vmem:[%s3310_s3 + $0x360] sm:$0xff]  ;;  %v1982_v38 = vpack.c.bf16 %v808_v35, %v800_v33 }
  0x2c   : > { %1874 = vmatprep.mubr.msk.bf16.mxu0 %vm416_vm1, %v2200_v10  ;;  %v1912_v10 = vpack.c.bf16 %v771_v8, %v763_v7  ;;  %v1984_v39 = vpack.c.bf16 %v807_v37, %v799_v36  ;;  %v812_v40 = vld [vmem:[%s3310_s3 + $0x388] sm:$0xff]  ;;  %v811_v42 = vld [vmem:[%s3310_s3 + $0x380] sm:$0xff] }
  0x2d   : > { %v820_v41 = vld [vmem:[%s3310_s3 + $0x3c8] sm:$0xff]  ;;  %v819_v44 = vld [vmem:[%s3310_s3 + $0x3c0] sm:$0xff] }
  0x2e   : > { %1913 = vmatpush1.bf16.msra.mxu1 %v1912_v10  ;;  %v1922_v43 = vpack.c.bf16 %v820_v41, %v812_v40  ;;  %v816_v45 = vld [vmem:[%s3310_s3 + $0x3a8] sm:$0xff]  ;;  %v1924_v48 = vpack.c.bf16 %v819_v44, %v811_v42  ;;  %v815_v50 = vld [vmem:[%s3310_s3 + $0x3a0] sm:$0xff] }
  0x2f   : > { %v824_v46 = vld [vmem:[%s3310_s3 + $0x3e8] sm:$0xff]  ;;  %v823_v51 = vld [vmem:[%s3310_s3 + $0x3e0] sm:$0xff] }
  0x30   : > { %v1986_v49 = vpack.c.bf16 %v824_v46, %v816_v45  ;;  %v1988_v53 = vpack.c.bf16 %v823_v51, %v815_v50  ;;  %v2619_v56 = vld [vmem:[%s3309_s2] ss:$0 sm:$0xff]  ;;  %v1178_v28 = vld [vmem:[%s3312_s5 + $0x88] sm:$0xff] }
  0x33   : > { %1875 = vmatmul.mubr.msk.bf16.gmra.mrb[12].mxu0 %vm416_vm1, %v2201_v11  ;;  %v776_v11 = vld [vmem:[%s3310_s3 + $0x268] sm:$0xff] }
  0x34   : > { %1878 = vmatprep.mubr.msk.bf16.mxu0 %vm416_vm1, %v2202_v12  ;;  %v767_v12 = vld [vmem:[%s3310_s3 + $0x220] sm:$0xff] }
  0x3b   : > { %1879 = vmatmul.mubr.msk.bf16.gmra.mrb[16].mxu0 %vm416_vm1, %v2203_v13  ;;  %v775_v13 = vld [vmem:[%s3310_s3 + $0x260] sm:$0xff] }
  0x3c   : > { %1882 = vmatprep.mubr.msk.bf16.mxu0 %vm416_vm1, %v2204_v14  ;;  %v1974_v14 = vpack.c.bf16 %v776_v11, %v768_v9 }
  0x3e   : > { %1975 = vmatprep.subr.bf16.mxu0 %v1974_v14 }
  0x43   : > { %1883 = vmatmul.mubr.msk.bf16.gmra.mrb[20].mxu0 %vm416_vm1, %v2205_v15  ;;  %v1976_v15 = vpack.c.bf16 %v775_v13, %v767_v12 }
  0x44   : > { %1886 = vmatprep.mubr.msk.bf16.mxu0 %vm416_vm1, %v2206_v16  ;;  %v780_v16 = vld [vmem:[%s3310_s3 + $0x288] sm:$0xff] }
  0x45   : > { %1977 = vmatpush1.bf16.msra.mxu0 %v1976_v15 }
  0x46   : > { %1979 = vmatprep.subr.bf16.mxu0 %v1978_v26 }
  0x49   : > { %1981 = vmatpush1.bf16.msra.mxu0 %v1980_v27  ;;  %v1177_v27 = vld [vmem:[%s3312_s5 + $0x80] sm:$0xff] }
  0x4a   : > { %1983 = vmatprep.subr.bf16.mxu0 %v1982_v38 }
  0x4b   : > { %1887 = vmatmul.mubr.msk.bf16.gmra.mrb[24].mxu0 %vm416_vm1, %v2207_v17  ;;  %v788_v17 = vld [vmem:[%s3310_s3 + $0x2c8] sm:$0xff] }
  0x4c   : > { %1890 = vmatprep.mubr.msk.bf16.mxu0 %vm416_vm1, %v2208_v18  ;;  %v1914_v18 = vpack.c.bf16 %v788_v17, %v780_v16 }
  0x4d   : > { %1985 = vmatpush1.bf16.msra.mxu0 %v1984_v39 }
  0x4e   : > { %1915 = vmatprep.subr.bf16.mxu1 %v1914_v18  ;;  %1987 = vmatprep.subr.bf16.mxu0 %v1986_v49 }
  0x51   : > { %1989 = vmatpush1.bf16.msra.mxu0 %v1988_v53 }
  0x53   : > { %1891 = vmatmul.mubr.msk.bf16.gmra.mrb[28].mxu0 %vm416_vm1, %v2209_v19  ;;  %v779_v19 = vld [vmem:[%s3310_s3 + $0x280] sm:$0xff] }
  0x54   : > { %v1916_v22 = vpack.c.bf16 %v787_v20, %v779_v19  ;;  %1075 = vmatprep.mubr.f32.mxu0 %v2278_v47 }
  0x56   : > { %1917 = vmatpush1.bf16.msra.mxu1 %v1916_v22 }
  0x57   : > { %1919 = vmatprep.subr.bf16.mxu1 %v1918_v30  ;;  %v2022_v30 = vpack.c.bf16 %v1178_v28, %v1177_v27 }
  0x59   : > { %2023 = vmatprep.subr.bf16.mxu0 %v2022_v30 }
  0x5a   : > { %1921 = vmatpush1.bf16.msra.mxu1 %v1920_v34 }
  0x5b   : > { %1923 = vmatprep.subr.bf16.mxu1 %v1922_v43 }
  0x5e   : > { %1925 = vmatpush1.bf16.msra.mxu1 %v1924_v48 }
  0x5f   : > { %1927 = vmatprep.subr.bf16.mxu1 %v1926_v55 }
  0xee   : > { %v1864_v57 = vpop.f32.mrb[0].mxu0 }
  0xef   : > { %v503_v58 = vpop.f32.mrb[1].mxu0  ;;  %v512_v62 = vadd.f32 %v1864_v57, %v2619_v56 }
  0xf0   : > { %v504_v59 = vadd.f32 %v2619_v56, %v503_v58  ;;  %v1865_v60 = vpop.f32.mrb[2].mxu0 }
  0xf1   : > { %v506_v61 = vpop.f32.mrb[3].mxu0  ;;  %v515_v1 = vadd.f32 %v1865_v60, %v2619_v56  ;;  %v632_v3 = vmax.f32 %v512_v62, 0.0 }
  0xf2   : > { %v507_v63 = vadd.f32 %v2619_v56, %v506_v61  ;;  %v630_v0 = vmax.f32 %v504_v59, 0.0 }
  0xf3   : > { %v633_v7 = vmax.f32 %v515_v1, 0.0 }
  0xf4   : > { %v631_v2 = vmax.f32 %v507_v63, 0.0 }
  0xf6   : > { %v662_v4 = vadd.f32 %v631_v2, %v630_v0  ;;  %v1868_v5 = vpop.f32.mrb[4].mxu0 }
  0xf7   : > { %v519_v6 = vpop.f32.mrb[5].mxu0  ;;  %v528_v12 = vadd.f32 %v1868_v5, %v2619_v56 }
  0xf8   : > { %v663_v8 = vadd.f32 %v662_v4, %v632_v3  ;;  %v520_v9 = vadd.f32 %v2619_v56, %v519_v6  ;;  %v1869_v10 = vpop.f32.mrb[6].mxu0 }
  0xf9   : > { %v522_v11 = vpop.f32.mrb[7].mxu0  ;;  %v531_v17 = vadd.f32 %v1869_v10, %v2619_v56  ;;  %v636_v19 = vmax.f32 %v528_v12, 0.0 }
  0xfa   : > { %v634_v13 = vmax.f32 %v520_v9, 0.0  ;;  %v664_v14 = vadd.f32 %v663_v8, %v633_v7  ;;  %v523_v15 = vadd.f32 %v2619_v56, %v522_v11 }
  0xfb   : > { %v637_v23 = vmax.f32 %v531_v17, 0.0 }
  0xfc   : > { %v665_v16 = vadd.f32 %v664_v14, %v634_v13  ;;  %v635_v18 = vmax.f32 %v523_v15, 0.0 }
  0xfe   : > { %v666_v20 = vadd.f32 %v665_v16, %v635_v18  ;;  %v1872_v21 = vpop.f32.mrb[8].mxu0 }
  0xff   : > { %v535_v22 = vpop.f32.mrb[9].mxu0  ;;  %v544_v31 = vadd.f32 %v1872_v21, %v2619_v56 }
 0x100   : > { %v667_v24 = vadd.f32 %v666_v20, %v636_v19  ;;  %v536_v25 = vadd.f32 %v2619_v56, %v535_v22  ;;  %v1873_v26 = vpop.f32.mrb[10].mxu0 }
 0x101   : > { %v538_v29 = vpop.f32.mrb[11].mxu0  ;;  %v547_v36 = vadd.f32 %v1873_v26, %v2619_v56  ;;  %v640_v38 = vmax.f32 %v544_v31, 0.0 }
 0x102   : > { %v638_v32 = vmax.f32 %v536_v25, 0.0  ;;  %v668_v33 = vadd.f32 %v667_v24, %v637_v23  ;;  %v539_v34 = vadd.f32 %v2619_v56, %v538_v29 }
 0x103   : > { %v641_v42 = vmax.f32 %v547_v36, 0.0 }
 0x104   : > { %v669_v35 = vadd.f32 %v668_v33, %v638_v32  ;;  %v639_v37 = vmax.f32 %v539_v34, 0.0 }
 0x106   : > { %v670_v39 = vadd.f32 %v669_v35, %v639_v37  ;;  %v1876_v40 = vpop.f32.mrb[12].mxu0 }
 0x107   : > { %v551_v41 = vpop.f32.mrb[13].mxu0  ;;  %v560_v48 = vadd.f32 %v1876_v40, %v2619_v56 }
 0x108   : > { %v671_v43 = vadd.f32 %v670_v39, %v640_v38  ;;  %v552_v44 = vadd.f32 %v2619_v56, %v551_v41  ;;  %v1877_v45 = vpop.f32.mrb[14].mxu0 }
 0x109   : > { %v554_v46 = vpop.f32.mrb[15].mxu0  ;;  %v563_v53 = vadd.f32 %v1877_v45, %v2619_v56  ;;  %v644_v55 = vmax.f32 %v560_v48, 0.0 }
 0x10a   : > { %v642_v49 = vmax.f32 %v552_v44, 0.0  ;;  %v672_v50 = vadd.f32 %v671_v43, %v641_v42  ;;  %v555_v51 = vadd.f32 %v2619_v56, %v554_v46 }
 0x10b   : > { %v645_v60 = vmax.f32 %v563_v53, 0.0 }
 0x10c   : > { %v673_v52 = vadd.f32 %v672_v50, %v642_v49  ;;  %v643_v54 = vmax.f32 %v555_v51, 0.0 }
 0x10e   : > { %v674_v57 = vadd.f32 %v673_v52, %v643_v54  ;;  %v1880_v58 = vpop.f32.mrb[16].mxu0 }
 0x10f   : > { %v567_v59 = vpop.f32.mrb[17].mxu0  ;;  %v576_v1 = vadd.f32 %v1880_v58, %v2619_v56 }
 0x110   : > { %v675_v61 = vadd.f32 %v674_v57, %v644_v55  ;;  %v568_v62 = vadd.f32 %v2619_v56, %v567_v59  ;;  %v1881_v63 = vpop.f32.mrb[18].mxu0 }
 0x111   : > { %v570_v0 = vpop.f32.mrb[19].mxu0  ;;  %v579_v6 = vadd.f32 %v1881_v63, %v2619_v56  ;;  %v648_v8 = vmax.f32 %v576_v1, 0.0 }
 0x112   : > { %v646_v2 = vmax.f32 %v568_v62, 0.0  ;;  %v676_v3 = vadd.f32 %v675_v61, %v645_v60  ;;  %v571_v4 = vadd.f32 %v2619_v56, %v570_v0 }
 0x113   : > { %v649_v12 = vmax.f32 %v579_v6, 0.0  ;;  %v1161_v6 = vld [vmem:[%s3312_s5] sm:$0xff] }
 0x114   : > { %v677_v5 = vadd.f32 %v676_v3, %v646_v2  ;;  %v647_v7 = vmax.f32 %v571_v4, 0.0  ;;  %v701_v3 = vld [vmem:[%s3310_s3 + $0x10] sm:$0xff] }
 0x115   : > { %v709_v4 = vld [vmem:[%s3310_s3 + $0x50] sm:$0xff] }
 0x116   : > { %v678_v9 = vadd.f32 %v677_v5, %v647_v7  ;;  %v1884_v10 = vpop.f32.mrb[20].mxu0  ;;  %v726_v5 = vld [vmem:[%s3310_s3 + $0xd8] sm:$0xff]  ;;  %v1162_v7 = vld [vmem:[%s3312_s5 + $0x8] sm:$0xff] }
 0x117   : > { %v583_v11 = vpop.f32.mrb[21].mxu0  ;;  %v592_v17 = vadd.f32 %v1884_v10, %v2619_v56  ;;  %v1180_v10 = vld [vmem:[%s3312_s5 + $0x98] sm:$0xff] }
 0x118   : > { %v679_v13 = vadd.f32 %v678_v9, %v648_v8  ;;  %v584_v14 = vadd.f32 %v2619_v56, %v583_v11  ;;  %v1885_v15 = vpop.f32.mrb[22].mxu0  ;;  %v1179_v9 = vld [vmem:[%s3312_s5 + $0x90] sm:$0xff]  ;;  %v1928_v11 = vpack.c.bf16 %v709_v4, %v701_v3  ;;  %v806_v4 = vld [vmem:[%s3310_s3 + $0x358] sm:$0xff] }
 0x119   : > { %v586_v16 = vpop.f32.mrb[23].mxu0  ;;  %v595_v22 = vadd.f32 %v1885_v15, %v2619_v56  ;;  %v652_v24 = vmax.f32 %v592_v17, 0.0  ;;  %v725_v15 = vld [vmem:[%s3310_s3 + $0xd0] sm:$0xff]  ;;  %v2024_v17 = vpack.c.bf16 %v1162_v7, %v1161_v6  ;;  %v1172_v6 = vld [vmem:[%s3312_s5 + $0x58] sm:$0xff]  ;;  %v1189_v7 = vld [vmem:[%s3312_s5 + $0xe0] sm:$0xff] }
 0x11a   : > { %v650_v18 = vmax.f32 %v584_v14, 0.0  ;;  %v680_v19 = vadd.f32 %v679_v13, %v649_v12  ;;  %v587_v20 = vadd.f32 %v2619_v56, %v586_v16  ;;  %v717_v14 = vld [vmem:[%s3310_s3 + $0x90] sm:$0xff]  ;;  %v734_v16 = vld [vmem:[%s3310_s3 + $0x118] sm:$0xff] }
 0x11b   : > { %v653_v28 = vmax.f32 %v595_v22, 0.0  ;;  %v1181_v22 = vld [vmem:[%s3312_s5 + $0xa0] sm:$0xff] }
 0x11c   : > { %v681_v21 = vadd.f32 %v680_v19, %v650_v18  ;;  %v651_v23 = vmax.f32 %v587_v20, 0.0  ;;  %v742_v18 = vld [vmem:[%s3310_s3 + $0x158] sm:$0xff]  ;;  %v2026_v19 = vpack.c.bf16 %v1180_v10, %v1179_v9  ;;  %v1163_v20 = vld [vmem:[%s3312_s5 + $0x10] sm:$0xff] }
 0x11e   : > { %v682_v25 = vadd.f32 %v681_v21, %v651_v23  ;;  %v1888_v26 = vpop.f32.mrb[24].mxu0  ;;  %v1164_v21 = vld [vmem:[%s3312_s5 + $0x18] sm:$0xff]  ;;  %v1182_v23 = vld [vmem:[%s3312_s5 + $0xa8] sm:$0xff] }
 0x11f   : > { %v599_v27 = vpop.f32.mrb[25].mxu0  ;;  %v608_v33 = vadd.f32 %v1888_v26, %v2619_v56  ;;  %v733_v26 = vld [vmem:[%s3310_s3 + $0x110] sm:$0xff] }
 0x120   : > { %v683_v29 = vadd.f32 %v682_v25, %v652_v24  ;;  %v600_v30 = vadd.f32 %v2619_v56, %v599_v27  ;;  %v1889_v31 = vpop.f32.mrb[26].mxu0  ;;  %v1932_v24 = vpack.c.bf16 %v725_v15, %v717_v14  ;;  %v1934_v25 = vpack.c.bf16 %v742_v18, %v734_v16  ;;  %v741_v27 = vld [vmem:[%s3310_s3 + $0x150] sm:$0xff]  ;;  %v814_v14 = vld [vmem:[%s3310_s3 + $0x398] sm:$0xff]  ;;  %v1173_v18 = vld [vmem:[%s3312_s5 + $0x60] sm:$0xff] }
 0x121   : > { %v602_v32 = vpop.f32.mrb[27].mxu0  ;;  %v611_v38 = vadd.f32 %v1889_v31, %v2619_v56  ;;  %v656_v40 = vmax.f32 %v608_v33, 0.0  ;;  %v2030_v31 = vpack.c.bf16 %v1182_v23, %v1181_v22  ;;  %v1166_v33 = vld [vmem:[%s3312_s5 + $0x28] sm:$0xff]  ;;  %v822_v16 = vld [vmem:[%s3310_s3 + $0x3d8] sm:$0xff]  ;;  %v813_v22 = vld [vmem:[%s3310_s3 + $0x390] sm:$0xff] }
 0x122   : > { %v654_v34 = vmax.f32 %v600_v30, 0.0  ;;  %v684_v35 = vadd.f32 %v683_v29, %v653_v28  ;;  %v603_v36 = vadd.f32 %v2619_v56, %v602_v32  ;;  %v750_v28 = vld [vmem:[%s3310_s3 + $0x198] sm:$0xff]  ;;  %v2028_v29 = vpack.c.bf16 %v1164_v21, %v1163_v20  ;;  %v1165_v32 = vld [vmem:[%s3312_s5 + $0x20] sm:$0xff]  ;;  %v821_v23 = vld [vmem:[%s3310_s3 + $0x3d0] sm:$0xff] }
 0x123   : > { %v657_v44 = vmax.f32 %v611_v38, 0.0  ;;  %v758_v30 = vld [vmem:[%s3310_s3 + $0x1d8] sm:$0xff]  ;;  %v749_v38 = vld [vmem:[%s3310_s3 + $0x190] sm:$0xff]  ;;  %v1954_v21 = vpack.c.bf16 %v822_v16, %v814_v14 }
 0x124   : > { %v685_v37 = vadd.f32 %v684_v35, %v654_v34  ;;  %v655_v39 = vmax.f32 %v603_v36, 0.0  ;;  %v1183_v34 = vld [vmem:[%s3312_s5 + $0xb0] sm:$0xff]  ;;  %v1184_v35 = vld [vmem:[%s3312_s5 + $0xb8] sm:$0xff]  ;;  %v1936_v36 = vpack.c.bf16 %v741_v27, %v733_v26  ;;  %v1956_v27 = vpack.c.bf16 %v821_v23, %v813_v22  ;;  %v1194_v22 = vld [vmem:[%s3312_s5 + $0x108] sm:$0xff] }
 0x125   : > { %v714_v26 = vld [vmem:[%s3310_s3 + $0x78] sm:$0xff]  ;;  %v1175_v14 = vld [vmem:[%s3312_s5 + $0x70] sm:$0xff] }
 0x126   : > { %v686_v41 = vadd.f32 %v685_v37, %v655_v39  ;;  %v1892_v42 = vpop.f32.mrb[28].mxu0  ;;  %v1938_v37 = vpack.c.bf16 %v758_v30, %v750_v28  ;;  %v757_v39 = vld [vmem:[%s3310_s3 + $0x1d0] sm:$0xff] }
 0x127   : > { %v615_v43 = vpop.f32.mrb[29].mxu0  ;;  %v624_v50 = vadd.f32 %v1892_v42, %v2619_v56  ;;  %v774_v42 = vld [vmem:[%s3310_s3 + $0x258] sm:$0xff]  ;;  %v713_v30 = vld [vmem:[%s3310_s3 + $0x70] sm:$0xff] }
 0x128   : > { %v687_v45 = vadd.f32 %v686_v41, %v656_v40  ;;  %v616_v46 = vadd.f32 %v2619_v56, %v615_v43  ;;  %v1893_v48 = vpop.f32.mrb[30].mxu0  ;;  %v766_v40 = vld [vmem:[%s3310_s3 + $0x218] sm:$0xff]  ;;  %v2032_v41 = vpack.c.bf16 %v1166_v33, %v1165_v32  ;;  %v2034_v43 = vpack.c.bf16 %v1184_v35, %v1183_v34  ;;  %v721_v35 = vld [vmem:[%s3310_s3 + $0xb0] sm:$0xff] }
 0x129   : > { %v618_v49 = vpop.f32.mrb[31].mxu0  ;;  %v627_v55 = vadd.f32 %v1893_v48, %v2619_v56  ;;  %v660_v58 = vmax.f32 %v624_v50, 0.0  ;;  %v1186_v48 = vld [vmem:[%s3312_s5 + $0xc8] sm:$0xff]  ;;  %v1942_v50 = vpack.c.bf16 %v774_v42, %v766_v40  ;;  %v730_v32 = vld [vmem:[%s3310_s3 + $0xf8] sm:$0xff]  ;;  %v745_v42 = vld [vmem:[%s3310_s3 + $0x170] sm:$0xff] }
 0x12a   : > { %v658_v51 = vmax.f32 %v616_v46, 0.0  ;;  %v688_v52 = vadd.f32 %v687_v45, %v657_v44  ;;  %v619_v53 = vadd.f32 %v2619_v56, %v618_v49  ;;  %v718_v56 = vld [vmem:[%s3310_s3 + $0x98] sm:$0xff]  ;;  %v1167_v44 = vld [vmem:[%s3312_s5 + $0x30] sm:$0xff]  ;;  %v1185_v46 = vld [vmem:[%s3312_s5 + $0xc0] sm:$0xff]  ;;  %v1940_v49 = vpack.c.bf16 %v757_v39, %v749_v38 }
 0x12b   : > { %v661_v60 = vmax.f32 %v627_v55, 0.0  ;;  %v1930_v13 = vpack.c.bf16 %v726_v5, %v718_v56  ;;  %v1168_v45 = vld [vmem:[%s3312_s5 + $0x38] sm:$0xff]  ;;  %v1171_v5 = vld [vmem:[%s3312_s5 + $0x50] sm:$0xff] }
 0x12c   : > { %v689_v54 = vadd.f32 %v688_v52, %v658_v51  ;;  %v659_v57 = vmax.f32 %v619_v53, 0.0  ;;  %v765_v51 = vld [vmem:[%s3310_s3 + $0x210] sm:$0xff]  ;;  %v782_v53 = vld [vmem:[%s3310_s3 + $0x298] sm:$0xff]  ;;  %v2044_v15 = vpack.c.bf16 %v1172_v6, %v1171_v5 }
 0x12d   : > { %v773_v52 = vld [vmem:[%s3310_s3 + $0x250] sm:$0xff]  ;;  %v790_v55 = vld [vmem:[%s3310_s3 + $0x2d8] sm:$0xff] }
 0x12e   : > { %v690_v59 = vadd.f32 %v689_v54, %v659_v57  ;;  %v2036_v54 = vpack.c.bf16 %v1168_v45, %v1167_v44  ;;  %v2038_v57 = vpack.c.bf16 %v1186_v48, %v1185_v46  ;;  %v746_v38 = vld [vmem:[%s3310_s3 + $0x178] sm:$0xff]  ;;  %v753_v46 = vld [vmem:[%s3310_s3 + $0x1b0] sm:$0xff] }
 0x12f   : > { %v762_v44 = vld [vmem:[%s3310_s3 + $0x1f8] sm:$0xff]  ;;  %v761_v48 = vld [vmem:[%s3310_s3 + $0x1f0] sm:$0xff] }
 0x130   : > { %v691_v61 = vadd.f32 %v690_v59, %v660_v58  ;;  %v1169_v58 = vld [vmem:[%s3312_s5 + $0x40] sm:$0xff]  ;;  %v1170_v59 = vld [vmem:[%s3312_s5 + $0x48] sm:$0xff] }
 0x131   : > { %v2040_v3 = vpack.c.bf16 %v1170_v59, %v1169_v58 }
 0x132   : > { %v692_v62 = vadd.f32 %v691_v61, %v661_v60  ;;  %v1187_v60 = vld [vmem:[%s3312_s5 + $0xd0] sm:$0xff]  ;;  %v1188_v61 = vld [vmem:[%s3312_s5 + $0xd8] sm:$0xff] }
 0x133   : > { %v2042_v56 = vpack.c.bf16 %v1188_v61, %v1187_v60  ;;  %v785_v60 = vld [vmem:[%s3310_s3 + $0x2b0] sm:$0xff] }
 0x134   : > { %v693_v63 = vrot.slane %v692_v62, 4  ;;  %v793_v61 = vld [vmem:[%s3310_s3 + $0x2f0] sm:$0xff] }
 0x136   : > { %v694_v0 = vadd.f32 %v693_v63, %v692_v62  ;;  %v1944_v62 = vpack.c.bf16 %v773_v52, %v765_v51  ;;  %v1946_v63 = vpack.c.bf16 %v790_v55, %v782_v53  ;;  %v2004_v51 = vpack.c.bf16 %v761_v48, %v753_v46  ;;  %v769_v53 = vld [vmem:[%s3310_s3 + $0x230] sm:$0xff]  ;;  %v786_v55 = vld [vmem:[%s3310_s3 + $0x2b8] sm:$0xff]  ;;  %v1202_v46 = vld [vmem:[%s3312_s5 + $0x148] sm:$0xff] }
 0x138   : > { %v695_v1 = vrot.slane %v694_v0, 2 }
 0x13a   : > { %v696_v2 = vadd.f32 %v695_v1, %v694_v0  ;;  %v781_v0 = vld [vmem:[%s3310_s3 + $0x290] sm:$0xff] }
 0x13b   : > { %v789_v1 = vld [vmem:[%s3310_s3 + $0x2d0] sm:$0xff] }
 0x13c   : > { %v697_v8 = vrot.slane %v696_v2, 1  ;;  %v1948_v9 = vpack.c.bf16 %v789_v1, %v781_v0  ;;  %v2012_v0 = vpack.c.bf16 %v793_v61, %v785_v60  ;;  %v1206_v60 = vld [vmem:[%s3312_s5 + $0x168] sm:$0xff] }
 0x13e   : > { %v2683_v12 = vadd.f32 %v697_v8, %v696_v2  ;;  %v798_v2 = vld [vmem:[%s3310_s3 + $0x318] sm:$0xff]  ;;  %v1190_v8 = vld [vmem:[%s3312_s5 + $0xe8] sm:$0xff] }
 0x13f   : > { %v1950_v10 = vpack.c.bf16 %v806_v4, %v798_v2  ;;  %v801_v2 = vld [vmem:[%s3310_s3 + $0x330] sm:$0xff]  ;;  %v818_v4 = vld [vmem:[%s3310_s3 + $0x3b8] sm:$0xff] }
 0x140   : > { %934 = vmatmul.mubr.f32.vlgmr.msra.gmra.mrb[0].mxu1 %v2683_v12  ;;  %1076 = vmatmul.mubr.f32.vlgmr.msra.gmra.mrb[32].mxu0 %v2683_v12 }
 0x141   : > { %1929 = vmatpush1.bf16.msra.mxu1 %v1928_v11  ;;  %1004 = vmatprep.mubr.f32.mxu1 %v2278_v47  ;;  %v797_v11 = vld [vmem:[%s3310_s3 + $0x310] sm:$0xff] }
 0x142   : > { %1931 = vmatprep.subr.bf16.mxu1 %v1930_v13  ;;  %2025 = vmatpush3.bf16.msra.mxu0 %v2024_v17  ;;  %v805_v13 = vld [vmem:[%s3310_s3 + $0x350] sm:$0xff]  ;;  %v2046_v17 = vpack.c.bf16 %v1190_v8, %v1189_v7 }
 0x143   : > { %2027 = vmatprep.subr.bf16.mxu0 %v2026_v19  ;;  %v1174_v19 = vld [vmem:[%s3312_s5 + $0x68] sm:$0xff]  ;;  %v1952_v20 = vpack.c.bf16 %v805_v13, %v797_v11  ;;  %v817_v7 = vld [vmem:[%s3310_s3 + $0x3b0] sm:$0xff]  ;;  %v1192_v11 = vld [vmem:[%s3312_s5 + $0xf8] sm:$0xff] }
 0x144   : > { %v825_v8 = vld [vmem:[%s3310_s3 + $0x3f0] sm:$0xff] }
 0x145   : > { %1933 = vmatpush1.bf16.msra.mxu1 %v1932_v24  ;;  %v2048_v24 = vpack.c.bf16 %v1174_v19, %v1173_v18  ;;  %v1241_v18 = vld [vmem:[%s3312_s5 + $0x280] sm:$0xff] }
 0x146   : > { %1935 = vmatprep.subr.bf16.mxu1 %v1934_v25  ;;  %2029 = vmatpush3.bf16.msra.mxu0 %v2028_v29  ;;  %v706_v25 = vld [vmem:[%s3310_s3 + $0x38] sm:$0xff]  ;;  %v705_v29 = vld [vmem:[%s3310_s3 + $0x30] sm:$0xff] }
 0x147   : > { %2031 = vmatprep.subr.bf16.mxu0 %v2030_v31  ;;  %v1990_v28 = vpack.c.bf16 %v714_v26, %v706_v25  ;;  %v722_v31 = vld [vmem:[%s3310_s3 + $0xb8] sm:$0xff]  ;;  %v1992_v33 = vpack.c.bf16 %v713_v30, %v705_v29  ;;  %v1211_v25 = vld [vmem:[%s3312_s5 + $0x190] sm:$0xff] }
 0x148   : > { %v1994_v34 = vpack.c.bf16 %v730_v32, %v722_v31  ;;  %v1212_v26 = vld [vmem:[%s3312_s5 + $0x198] sm:$0xff]  ;;  %v1213_v31 = vld [vmem:[%s3312_s5 + $0x1a0] sm:$0xff]  ;;  %v1214_v32 = vld [vmem:[%s3312_s5 + $0x1a8] sm:$0xff] }
 0x149   : > { %1937 = vmatpush1.bf16.msra.mxu1 %v1936_v36  ;;  %v729_v36 = vld [vmem:[%s3310_s3 + $0xf0] sm:$0xff]  ;;  %v1196_v29 = vld [vmem:[%s3312_s5 + $0x118] sm:$0xff] }
 0x14a   : > { %1939 = vmatprep.subr.bf16.mxu1 %v1938_v37  ;;  %2033 = vmatpush3.bf16.msra.mxu0 %v2032_v41  ;;  %v738_v37 = vld [vmem:[%s3310_s3 + $0x138] sm:$0xff]  ;;  %v1996_v39 = vpack.c.bf16 %v729_v36, %v721_v35  ;;  %v737_v41 = vld [vmem:[%s3310_s3 + $0x130] sm:$0xff]  ;;  %v1198_v35 = vld [vmem:[%s3312_s5 + $0x128] sm:$0xff] }
 0x14b   : > { %2035 = vmatprep.subr.bf16.mxu0 %v2034_v43  ;;  %v1998_v40 = vpack.c.bf16 %v746_v38, %v738_v37  ;;  %v754_v43 = vld [vmem:[%s3310_s3 + $0x1b8] sm:$0xff]  ;;  %v1215_v37 = vld [vmem:[%s3312_s5 + $0x1b0] sm:$0xff] }
 0x14c   : > { %v2002_v45 = vpack.c.bf16 %v762_v44, %v754_v43  ;;  %v1216_v38 = vld [vmem:[%s3312_s5 + $0x1b8] sm:$0xff]  ;;  %v1217_v43 = vld [vmem:[%s3312_s5 + $0x1c0] sm:$0xff]  ;;  %v1218_v44 = vld [vmem:[%s3312_s5 + $0x1c8] sm:$0xff] }
 0x14d   : > { %1941 = vmatpush1.bf16.msra.mxu1 %v1940_v49  ;;  %v770_v49 = vld [vmem:[%s3310_s3 + $0x238] sm:$0xff] }
 0x14e   : > { %1943 = vmatprep.subr.bf16.mxu1 %v1942_v50  ;;  %2037 = vmatpush3.bf16.msra.mxu0 %v2036_v54  ;;  %v778_v50 = vld [vmem:[%s3310_s3 + $0x278] sm:$0xff]  ;;  %v777_v54 = vld [vmem:[%s3310_s3 + $0x270] sm:$0xff] }
 0x14f   : > { %2039 = vmatprep.subr.bf16.mxu0 %v2038_v57  ;;  %v2006_v52 = vpack.c.bf16 %v778_v50, %v770_v49  ;;  %v794_v57 = vld [vmem:[%s3310_s3 + $0x2f8] sm:$0xff]  ;;  %v2008_v58 = vpack.c.bf16 %v777_v54, %v769_v53  ;;  %v1219_v49 = vld [vmem:[%s3312_s5 + $0x1d0] sm:$0xff] }
 0x150   : > { %v2010_v59 = vpack.c.bf16 %v794_v57, %v786_v55  ;;  %v1220_v50 = vld [vmem:[%s3312_s5 + $0x1d8] sm:$0xff]  ;;  %v1221_v55 = vld [vmem:[%s3312_s5 + $0x1e0] sm:$0xff]  ;;  %v1222_v57 = vld [vmem:[%s3312_s5 + $0x1e8] sm:$0xff] }
 0x151   : > { %1945 = vmatpush1.bf16.msra.mxu1 %v1944_v62  ;;  %v802_v62 = vld [vmem:[%s3310_s3 + $0x338] sm:$0xff] }
 0x152   : > { %1947 = vmatprep.subr.bf16.mxu1 %v1946_v63  ;;  %2041 = vmatpush3.bf16.msra.mxu0 %v2040_v3  ;;  %v810_v63 = vld [vmem:[%s3310_s3 + $0x378] sm:$0xff]  ;;  %v809_v3 = vld [vmem:[%s3310_s3 + $0x370] sm:$0xff] }
 0x153   : > { %2043 = vmatprep.subr.bf16.mxu0 %v2042_v56  ;;  %v2014_v1 = vpack.c.bf16 %v810_v63, %v802_v62  ;;  %v826_v56 = vld [vmem:[%s3310_s3 + $0x3f8] sm:$0xff]  ;;  %v2016_v5 = vpack.c.bf16 %v809_v3, %v801_v2  ;;  %v1223_v62 = vld [vmem:[%s3312_s5 + $0x1f0] sm:$0xff] }
 0x154   : > { %v2018_v6 = vpack.c.bf16 %v826_v56, %v818_v4  ;;  %v1204_v53 = vld [vmem:[%s3312_s5 + $0x158] sm:$0xff]  ;;  %v1273_v4 = vld [vmem:[%s3312_s5 + $0x380] sm:$0xff]  ;;  %v1274_v56 = vld [vmem:[%s3312_s5 + $0x388] sm:$0xff] }
 0x155   : > { %1949 = vmatpush1.bf16.msra.mxu1 %v1948_v9  ;;  %v2020_v9 = vpack.c.bf16 %v825_v8, %v817_v7  ;;  %v1224_v63 = vld [vmem:[%s3312_s5 + $0x1f8] sm:$0xff] }
 0x156   : > { %1951 = vmatprep.subr.bf16.mxu1 %v1950_v10  ;;  %2045 = vmatpush3.bf16.msra.mxu0 %v2044_v15  ;;  %v1191_v10 = vld [vmem:[%s3312_s5 + $0xf0] sm:$0xff]  ;;  %v1176_v15 = vld [vmem:[%s3312_s5 + $0x78] sm:$0xff] }
 0x157   : > { %2047 = vmatprep.subr.bf16.mxu0 %v2046_v17  ;;  %v2050_v13 = vpack.c.bf16 %v1192_v11, %v1191_v10  ;;  %v2052_v16 = vpack.c.bf16 %v1176_v15, %v1175_v14  ;;  %v1210_v17 = vld [vmem:[%s3312_s5 + $0x188] sm:$0xff]  ;;  %v1208_v2 = vld [vmem:[%s3312_s5 + $0x178] sm:$0xff] }
 0x159   : > { %1953 = vmatpush1.bf16.msra.mxu1 %v1952_v20  ;;  %v1242_v20 = vld [vmem:[%s3312_s5 + $0x288] sm:$0xff] }
 0x15a   : > { %1955 = vmatprep.subr.bf16.mxu1 %v1954_v21  ;;  %2049 = vmatpush3.bf16.msra.mxu0 %v2048_v24  ;;  %v1193_v21 = vld [vmem:[%s3312_s5 + $0x100] sm:$0xff]  ;;  %v2086_v23 = vpack.c.bf16 %v1242_v20, %v1241_v18 }
 0x15b   : > { %2051 = vmatprep.subr.bf16.mxu0 %v2050_v13  ;;  %v2056_v24 = vpack.c.bf16 %v1194_v22, %v1193_v21  ;;  %v1225_v20 = vld [vmem:[%s3312_s5 + $0x200] sm:$0xff]  ;;  %v1226_v21 = vld [vmem:[%s3312_s5 + $0x208] sm:$0xff] }
 0x15d   : > { %1957 = vmatpush1.bf16.msra.mxu1 %v1956_v27  ;;  %v2058_v27 = vpack.c.bf16 %v1212_v26, %v1211_v25  ;;  %v1244_v25 = vld [vmem:[%s3312_s5 + $0x298] sm:$0xff] }
 0x15e   : > { %1991 = vmatprep.subr.bf16.mxu1 %v1990_v28  ;;  %2053 = vmatpush3.bf16.msra.mxu0 %v2052_v16  ;;  %v1195_v28 = vld [vmem:[%s3312_s5 + $0x110] sm:$0xff] }
 0x15f   : > { %2087 = vmatprep.subr.bf16.mxu0 %v2086_v23  ;;  %v2060_v30 = vpack.c.bf16 %v1196_v29, %v1195_v28 }
 0x160   : > { %1005 = vmatmul.mubr.f32.vlgmr.msra.gmra.mrb[2].mxu1 %v2683_v12 }
 0x161   : > { %1993 = vmatpush1.bf16.msra.mxu1 %v1992_v33  ;;  %1146 = vmatprep.mubr.f32.mxu1 %v2278_v47  ;;  %v2000_v47 = vpack.c.bf16 %v745_v42, %v737_v41  ;;  %v2062_v33 = vpack.c.bf16 %v1214_v32, %v1213_v31  ;;  %v1200_v41 = vld [vmem:[%s3312_s5 + $0x138] sm:$0xff] }
 0x162   : > { %1995 = vmatprep.subr.bf16.mxu1 %v1994_v34  ;;  %v1197_v34 = vld [vmem:[%s3312_s5 + $0x120] sm:$0xff]  ;;  %v1228_v31 = vld [vmem:[%s3312_s5 + $0x218] sm:$0xff] }
 0x163   : > { %v2064_v36 = vpack.c.bf16 %v1198_v35, %v1197_v34  ;;  %v1246_v34 = vld [vmem:[%s3312_s5 + $0x2a8] sm:$0xff] }
 0x165   : > { %1997 = vmatpush1.bf16.msra.mxu1 %v1996_v39  ;;  %v2066_v39 = vpack.c.bf16 %v1216_v38, %v1215_v37  ;;  %v1229_v37 = vld [vmem:[%s3312_s5 + $0x220] sm:$0xff]  ;;  %v1230_v38 = vld [vmem:[%s3312_s5 + $0x228] sm:$0xff] }
 0x166   : > { %1999 = vmatprep.subr.bf16.mxu1 %v1998_v40  ;;  %v1199_v40 = vld [vmem:[%s3312_s5 + $0x130] sm:$0xff] }
 0x167   : > { %v2068_v42 = vpack.c.bf16 %v1200_v41, %v1199_v40  ;;  %v1248_v40 = vld [vmem:[%s3312_s5 + $0x2b8] sm:$0xff]  ;;  %v2096_v41 = vpack.c.bf16 %v1230_v38, %v1229_v37 }
 0x168   : > { %v1280_v37 = vld [vmem:[%s3312_s5 + $0x3b8] sm:$0xff] }
 0x169   : > { %2001 = vmatpush1.bf16.msra.mxu1 %v2000_v47  ;;  %v2070_v47 = vpack.c.bf16 %v1218_v44, %v1217_v43  ;;  %v1231_v43 = vld [vmem:[%s3312_s5 + $0x230] sm:$0xff]  ;;  %v1232_v44 = vld [vmem:[%s3312_s5 + $0x238] sm:$0xff] }
 0x16a   : > { %2003 = vmatprep.subr.bf16.mxu1 %v2002_v45  ;;  %v1201_v45 = vld [vmem:[%s3312_s5 + $0x140] sm:$0xff] }
 0x16b   : > { %v2072_v48 = vpack.c.bf16 %v1202_v46, %v1201_v45  ;;  %v1250_v45 = vld [vmem:[%s3312_s5 + $0x2c8] sm:$0xff]  ;;  %v2100_v46 = vpack.c.bf16 %v1232_v44, %v1231_v43 }
 0x16c   : > { %v1282_v43 = vld [vmem:[%s3312_s5 + $0x3c8] sm:$0xff] }
 0x16d   : > { %2005 = vmatpush1.bf16.msra.mxu1 %v2004_v51  ;;  %v2074_v51 = vpack.c.bf16 %v1220_v50, %v1219_v49  ;;  %v1233_v49 = vld [vmem:[%s3312_s5 + $0x240] sm:$0xff]  ;;  %v1234_v50 = vld [vmem:[%s3312_s5 + $0x248] sm:$0xff] }
 0x16e   : > { %2007 = vmatprep.subr.bf16.mxu1 %v2006_v52  ;;  %v1203_v52 = vld [vmem:[%s3312_s5 + $0x150] sm:$0xff] }
 0x16f   : > { %v2076_v54 = vpack.c.bf16 %v1204_v53, %v1203_v52  ;;  %v1252_v52 = vld [vmem:[%s3312_s5 + $0x2d8] sm:$0xff]  ;;  %v2104_v53 = vpack.c.bf16 %v1234_v50, %v1233_v49 }
 0x170   : > { %v1284_v49 = vld [vmem:[%s3312_s5 + $0x3d8] sm:$0xff] }
 0x171   : > { %2009 = vmatpush1.bf16.msra.mxu1 %v2008_v58  ;;  %v2078_v58 = vpack.c.bf16 %v1222_v57, %v1221_v55  ;;  %v1235_v55 = vld [vmem:[%s3312_s5 + $0x250] sm:$0xff]  ;;  %v1236_v57 = vld [vmem:[%s3312_s5 + $0x258] sm:$0xff] }
 0x172   : > { %2011 = vmatprep.subr.bf16.mxu1 %v2010_v59  ;;  %v1205_v59 = vld [vmem:[%s3312_s5 + $0x160] sm:$0xff] }
 0x173   : > { %v2080_v61 = vpack.c.bf16 %v1206_v60, %v1205_v59  ;;  %v1254_v59 = vld [vmem:[%s3312_s5 + $0x2e8] sm:$0xff]  ;;  %v2108_v60 = vpack.c.bf16 %v1236_v57, %v1235_v55 }
 0x174   : > { %v1286_v55 = vld [vmem:[%s3312_s5 + $0x3e8] sm:$0xff] }
 0x175   : > { %2013 = vmatpush1.bf16.msra.mxu1 %v2012_v0  ;;  %v2082_v0 = vpack.c.bf16 %v1224_v63, %v1223_v62 }
 0x176   : > { %2015 = vmatprep.subr.bf16.mxu1 %v2014_v1  ;;  %v1207_v1 = vld [vmem:[%s3312_s5 + $0x170] sm:$0xff] }
 0x177   : > { %v2084_v3 = vpack.c.bf16 %v1208_v2, %v1207_v1  ;;  %v1238_v1 = vld [vmem:[%s3312_s5 + $0x268] sm:$0xff] }
 0x179   : > { %2017 = vmatpush1.bf16.msra.mxu1 %v2016_v5  ;;  %v2118_v5 = vpack.c.bf16 %v1274_v56, %v1273_v4  ;;  %v1256_v4 = vld [vmem:[%s3312_s5 + $0x2f8] sm:$0xff] }
 0x17a   : > { %2019 = vmatprep.subr.bf16.mxu1 %v2018_v6  ;;  %v829_v6 = vlaneseq }
 0x17c   : > { %v3051_v7 = vshrl.u32 %v829_v6, 7 }
 0x17d   : > { %2021 = vmatpush1.bf16.msra.mxu1 %v2020_v9  ;;  %v3057_v9 = vld [vmem:[%s3311_s4] sm:$0xff] }
 0x17e   : > { %v831_v8 = vsub.s32 0, %v3051_v7  ;;  %v835_v10 = vsub.s32 1, %v3051_v7  ;;  %v851_v11 = vsub.s32 5, %v3051_v7  ;;  %v839_v63 = vsub.s32 2, %v3051_v7 }
 0x17f   : > { %v843_v2 = vsub.s32 3, %v3051_v7 }
 0x180   : > { %1147 = vmatmul.mubr.f32.vlgmr.msra.gmra.mrb[4].mxu1 %v2683_v12  ;;  %v1209_v12 = vld [vmem:[%s3312_s5 + $0x180] sm:$0xff]  ;;  %v832_v13 = vrot.slane %v3057_v9, %v831_v8  ;;  %v836_v14 = vrot.slane %v3057_v9, %v835_v10  ;;  %v852_v15 = vrot.slane %v3057_v9, %v851_v11  ;;  %v840_v6 = vrot.slane %v3057_v9, %v839_v63  ;;  %v1239_v10 = vld [vmem:[%s3312_s5 + $0x270] sm:$0xff]  ;;  %v1240_v11 = vld [vmem:[%s3312_s5 + $0x278] sm:$0xff] }
 0x181   : > { %v2054_v19 = vpack.c.bf16 %v1210_v17, %v1209_v12  ;;  %v1287_v63 = vld [vmem:[%s3312_s5 + $0x3f0] sm:$0xff] }
 0x183   : > { %2055 = vmatprep.subr.bf16.mxu1 %v2054_v19 }
 0x184   : > { %2057 = vmatpush3.bf16.msra.mxu1 %v2056_v24  ;;  %v1243_v24 = vld [vmem:[%s3312_s5 + $0x290] sm:$0xff] }
 0x185   : > { %2059 = vmatprep.subr.bf16.mxu1 %v2058_v27  ;;  %v2088_v27 = vpack.c.bf16 %v1226_v21, %v1225_v20  ;;  %v2090_v29 = vpack.c.bf16 %v1244_v25, %v1243_v24  ;;  %v1258_v20 = vld [vmem:[%s3312_s5 + $0x308] sm:$0xff] }
 0x188   : > { %2061 = vmatpush3.bf16.msra.mxu1 %v2060_v30  ;;  %v1227_v30 = vld [vmem:[%s3312_s5 + $0x210] sm:$0xff] }
 0x189   : > { %2063 = vmatprep.subr.bf16.mxu1 %v2062_v33  ;;  %v1245_v33 = vld [vmem:[%s3312_s5 + $0x2a0] sm:$0xff]  ;;  %v2092_v35 = vpack.c.bf16 %v1228_v31, %v1227_v30  ;;  %v1278_v31 = vld [vmem:[%s3312_s5 + $0x3a8] sm:$0xff] }
 0x18a   : > { %v1277_v30 = vld [vmem:[%s3312_s5 + $0x3a0] sm:$0xff] }
 0x18c   : > { %2065 = vmatpush3.bf16.msra.mxu1 %v2064_v36  ;;  %v2094_v36 = vpack.c.bf16 %v1246_v34, %v1245_v33  ;;  %v2126_v33 = vpack.c.bf16 %v1278_v31, %v1277_v30  ;;  %v1261_v34 = vld [vmem:[%s3312_s5 + $0x320] sm:$0xff] }
 0x18d   : > { %2067 = vmatprep.subr.bf16.mxu1 %v2066_v39  ;;  %v1247_v39 = vld [vmem:[%s3312_s5 + $0x2b0] sm:$0xff] }
 0x190   : > { %2069 = vmatpush3.bf16.msra.mxu1 %v2068_v42  ;;  %v2098_v42 = vpack.c.bf16 %v1248_v40, %v1247_v39  ;;  %v1263_v40 = vld [vmem:[%s3312_s5 + $0x330] sm:$0xff] }
 0x191   : > { %2071 = vmatprep.subr.bf16.mxu1 %v2070_v47  ;;  %v1249_v47 = vld [vmem:[%s3312_s5 + $0x2c0] sm:$0xff] }
 0x194   : > { %2073 = vmatpush3.bf16.msra.mxu1 %v2072_v48  ;;  %v2102_v48 = vpack.c.bf16 %v1250_v45, %v1249_v47  ;;  %v1265_v45 = vld [vmem:[%s3312_s5 + $0x340] sm:$0xff] }
 0x195   : > { %2075 = vmatprep.subr.bf16.mxu1 %v2074_v51  ;;  %v1251_v51 = vld [vmem:[%s3312_s5 + $0x2d0] sm:$0xff] }
 0x198   : > { %2077 = vmatpush3.bf16.msra.mxu1 %v2076_v54  ;;  %v2106_v54 = vpack.c.bf16 %v1252_v52, %v1251_v51  ;;  %v1267_v52 = vld [vmem:[%s3312_s5 + $0x350] sm:$0xff] }
 0x199   : > { %2079 = vmatprep.subr.bf16.mxu1 %v2078_v58  ;;  %v1253_v58 = vld [vmem:[%s3312_s5 + $0x2e0] sm:$0xff] }
 0x19a   : > { %v2110_v62 = vpack.c.bf16 %v1254_v59, %v1253_v58  ;;  %v855_v59 = vsub.s32 6, %v3051_v7 }
 0x19c   : > { %2081 = vmatpush3.bf16.msra.mxu1 %v2080_v61  ;;  %v847_v61 = vsub.s32 4, %v3051_v7 }
 0x19d   : > { %2083 = vmatprep.subr.bf16.mxu1 %v2082_v0  ;;  %v1237_v0 = vld [vmem:[%s3312_s5 + $0x260] sm:$0xff] }
 0x19e   : > { %v2112_v56 = vpack.c.bf16 %v1238_v1, %v1237_v0  ;;  %v1288_v0 = vld [vmem:[%s3312_s5 + $0x3f8] sm:$0xff] }
 0x1a0   : > { %2085 = vmatpush3.bf16.msra.mxu1 %v2084_v3  ;;  %v1255_v3 = vld [vmem:[%s3312_s5 + $0x2f0] sm:$0xff] }
 0x1a1   : > { %2119 = vmatprep.subr.bf16.mxu1 %v2118_v5  ;;  %v848_v5 = vrot.slane %v3057_v9, %v847_v61  ;;  %v2114_v8 = vpack.c.bf16 %v1256_v4, %v1255_v3  ;;  %v1270_v61 = vld [vmem:[%s3312_s5 + $0x368] sm:$0xff]  ;;  %v2146_v3 = vpack.c.bf16 %v1288_v0, %v1287_v63  ;;  %v1271_v4 = vld [vmem:[%s3312_s5 + $0x370] sm:$0xff] }
 0x213   : > { %v935_v16 = vpop.f32.mrb[0].mxu1  ;;  %v3064_v12 = vpop.f32.mrb[32].mxu0 }
 0x214   : > { %v936_v17 = vadd.f32 %v935_v16, %v832_v13  ;;  %v937_v18 = vpop.f32.mrb[1].mxu1  ;;  %v1079_v19 = vpop.f32.mrb[33].mxu0  ;;  %v844_v13 = vrot.slane %v3057_v9, %v843_v2  ;;  %v1078_v16 = vadd.f32 %v3064_v12, %v848_v5  ;;  %v1276_v12 = vld [vmem:[%s3312_s5 + $0x398] sm:$0xff]  ;;  %v856_v2 = vrot.slane %v3057_v9, %v855_v59 }
 0x215   : > { %v938_v22 = vadd.f32 %v937_v18, %v836_v14  ;;  %v1080_v23 = vadd.f32 %v1079_v19, %v852_v15  ;;  %v2116_v15 = vpack.c.bf16 %v1240_v11, %v1239_v10  ;;  %v1257_v19 = vld [vmem:[%s3312_s5 + $0x300] sm:$0xff] }
 0x216   : > { %v1153_v28 = vmax.f32 %v936_v17, 0.0  ;;  %v2120_v24 = vpack.c.bf16 %v1258_v20, %v1257_v19  ;;  %v1157_v25 = vmax.f32 %v1078_v16, 0.0 }
 0x217   : > { %v1154_v26 = vmax.f32 %v938_v22, 0.0  ;;  %v1158_v32 = vmax.f32 %v1080_v23, 0.0  ;;  %v1275_v22 = vld [vmem:[%s3312_s5 + $0x390] sm:$0xff] }
 0x219   : > { %1354 = vmatprep.mubr.f32.mxu0 %v1154_v26 }
 0x21a   : > { %1355 = vmatmul.mubr.f32.vlgmr.msra.gmra.mrb[34].mxu0 %v1153_v28  ;;  %v1259_v28 = vld [vmem:[%s3312_s5 + $0x310] sm:$0xff] }
 0x21b   : > { %2089 = vmatpush3.bf16.msra.mxu0 %v2088_v27  ;;  %1494 = vmatprep.mubr.f32.mxu0 %v1158_v32  ;;  %v2122_v27 = vpack.c.bf16 %v1276_v12, %v1275_v22 }
 0x21c   : > { %2091 = vmatprep.subr.bf16.mxu0 %v2090_v29  ;;  %v1260_v29 = vld [vmem:[%s3312_s5 + $0x318] sm:$0xff] }
 0x21d   : > { %v2124_v32 = vpack.c.bf16 %v1260_v29, %v1259_v28 }
 0x21f   : > { %2093 = vmatpush3.bf16.msra.mxu0 %v2092_v35  ;;  %v1262_v35 = vld [vmem:[%s3312_s5 + $0x328] sm:$0xff] }
 0x220   : > { %2095 = vmatprep.subr.bf16.mxu0 %v2094_v36  ;;  %v1279_v36 = vld [vmem:[%s3312_s5 + $0x3b0] sm:$0xff]  ;;  %v2128_v38 = vpack.c.bf16 %v1262_v35, %v1261_v34 }
 0x221   : > { %v2130_v39 = vpack.c.bf16 %v1280_v37, %v1279_v36 }
 0x223   : > { %2097 = vmatpush3.bf16.msra.mxu0 %v2096_v41  ;;  %v1264_v41 = vld [vmem:[%s3312_s5 + $0x338] sm:$0xff] }
 0x224   : > { %2099 = vmatprep.subr.bf16.mxu0 %v2098_v42  ;;  %v1281_v42 = vld [vmem:[%s3312_s5 + $0x3c0] sm:$0xff]  ;;  %v2132_v44 = vpack.c.bf16 %v1264_v41, %v1263_v40 }
 0x225   : > { %v2134_v47 = vpack.c.bf16 %v1282_v43, %v1281_v42 }
 0x227   : > { %2101 = vmatpush3.bf16.msra.mxu0 %v2100_v46  ;;  %v1266_v46 = vld [vmem:[%s3312_s5 + $0x348] sm:$0xff] }
 0x228   : > { %2103 = vmatprep.subr.bf16.mxu0 %v2102_v48  ;;  %v1283_v48 = vld [vmem:[%s3312_s5 + $0x3d0] sm:$0xff]  ;;  %v2136_v50 = vpack.c.bf16 %v1266_v46, %v1265_v45 }
 0x229   : > { %v2138_v51 = vpack.c.bf16 %v1284_v49, %v1283_v48 }
 0x22b   : > { %2105 = vmatpush3.bf16.msra.mxu0 %v2104_v53  ;;  %v1268_v53 = vld [vmem:[%s3312_s5 + $0x358] sm:$0xff] }
 0x22c   : > { %2107 = vmatprep.subr.bf16.mxu0 %v2106_v54  ;;  %v1285_v54 = vld [vmem:[%s3312_s5 + $0x3e0] sm:$0xff]  ;;  %v2140_v57 = vpack.c.bf16 %v1268_v53, %v1267_v52 }
 0x22d   : > { %v2142_v58 = vpack.c.bf16 %v1286_v55, %v1285_v54 }
 0x22f   : > { %2109 = vmatpush3.bf16.msra.mxu0 %v2108_v60  ;;  %v1269_v60 = vld [vmem:[%s3312_s5 + $0x360] sm:$0xff] }
 0x230   : > { %2111 = vmatprep.subr.bf16.mxu0 %v2110_v62  ;;  %v859_v62 = vsub.s32 7, %v3051_v7  ;;  %v2144_v1 = vpack.c.bf16 %v1270_v61, %v1269_v60  ;;  %v1272_v7 = vld [vmem:[%s3312_s5 + $0x378] sm:$0xff] }
 0x233   : > { %v1006_v14 = vpop.f32.mrb[2].mxu1  ;;  %2113 = vmatpush3.bf16.msra.mxu0 %v2112_v56  ;;  %v860_v56 = vrot.slane %v3057_v9, %v859_v62 }
 0x234   : > { %v1007_v17 = vadd.f32 %v1006_v14, %v840_v6  ;;  %v1008_v18 = vpop.f32.mrb[3].mxu1  ;;  %2115 = vmatprep.subr.bf16.mxu0 %v2114_v8  ;;  %v2148_v6 = vpack.c.bf16 %v1272_v7, %v1271_v4 }
 0x235   : > { %v1009_v21 = vadd.f32 %v1008_v18, %v844_v13  ;;  %v1289_v18 = vld [vmem:[%s3313_s6] sm:$0x1] }
 0x236   : > { %v1155_v26 = vmax.f32 %v1007_v17, 0.0 }
 0x237   : > { %v1156_v23 = vmax.f32 %v1009_v21, 0.0  ;;  %2117 = vmatpush3.bf16.msra.mxu0 %v2116_v15 }
 0x239   : > { %1424 = vmatprep.mubr.f32.mxu1 %v1156_v23 }
 0x23a   : > { %1425 = vmatmul.mubr.f32.vlgmr.msra.gmra.mrb[6].mxu1 %v1155_v26  ;;  %1495 = vmatmul.mubr.f32.vlgmr.msra.gmra.mrb[36].mxu0 %v1157_v25 }
 0x23b   : > { %2121 = vmatpush3.bf16.msra.mxu1 %v2120_v24 }
 0x23c   : > { %2123 = vmatprep.subr.bf16.mxu1 %v2122_v27 }
 0x23f   : > { %2125 = vmatpush3.bf16.msra.mxu1 %v2124_v32 }
 0x240   : > { %2127 = vmatprep.subr.bf16.mxu1 %v2126_v33 }
 0x243   : > { %2129 = vmatpush3.bf16.msra.mxu1 %v2128_v38 }
 0x244   : > { %2131 = vmatprep.subr.bf16.mxu1 %v2130_v39 }
 0x247   : > { %2133 = vmatpush3.bf16.msra.mxu1 %v2132_v44 }
 0x248   : > { %2135 = vmatprep.subr.bf16.mxu1 %v2134_v47 }
 0x24b   : > { %2137 = vmatpush3.bf16.msra.mxu1 %v2136_v50 }
 0x24c   : > { %2139 = vmatprep.subr.bf16.mxu1 %v2138_v51 }
 0x24f   : > { %2141 = vmatpush3.bf16.msra.mxu1 %v2140_v57 }
 0x250   : > { %2143 = vmatprep.subr.bf16.mxu1 %v2142_v58 }
 0x253   : > { %v1148_v5 = vpop.f32.mrb[4].mxu1  ;;  %2145 = vmatpush3.bf16.msra.mxu1 %v2144_v1 }
 0x254   : > { %v1149_v8 = vadd.f32 %v1148_v5, %v856_v2  ;;  %v1150_v10 = vpop.f32.mrb[5].mxu1  ;;  %2147 = vmatprep.subr.bf16.mxu1 %v2146_v3 }
 0x255   : > { %v1151_v11 = vadd.f32 %v1150_v10, %v860_v56 }
 0x256   : > { %v1159_v14 = vmax.f32 %v1149_v8, 0.0 }
 0x257   : > { %v1160_v13 = vmax.f32 %v1151_v11, 0.0  ;;  %2149 = vmatpush3.bf16.msra.mxu1 %v2148_v6 }
 0x259   : > { %1564 = vmatprep.mubr.f32.mxu1 %v1160_v13 }
 0x25a   : > { %1565 = vmatmul.mubr.f32.vlgmr.msra.gmra.mrb[8].mxu1 %v1159_v14 }
 0x2ed   : > { %v1748_v15 = vpop.f32.mrb[34].mxu0 }
 0x2ee   : > { %v1749_v16 = vpop.f32.mrb[35].mxu0 }
 0x2ef   : > { %v1750_v17 = vadd.f32 %v1749_v16, %v1748_v15 }
 0x2f1   : > { %v1357_v22 = vadd.f32 %v1750_v17, %v1289_v18 }
 0x30d   : > { %v1783_v9 = vpop.f32.mrb[6].mxu1  ;;  %v1818_v19 = vpop.f32.mrb[36].mxu0 }
 0x30e   : > { %v1784_v20 = vpop.f32.mrb[7].mxu1  ;;  %v1819_v21 = vpop.f32.mrb[37].mxu0 }
 0x30f   : > { %v1785_v12 = vadd.f32 %v1784_v20, %v1783_v9  ;;  %v1820_v23 = vadd.f32 %v1819_v21, %v1818_v19 }
 0x311   : > { %v1427_v24 = vadd.f32 %v1785_v12, %v1357_v22 }
 0x313   : > { %v1497_v25 = vadd.f32 %v1820_v23, %v1427_v24 }
 0x32d   : > { %v1853_v26 = vpop.f32.mrb[8].mxu1 }
 0x32e   : > { %v1854_v27 = vpop.f32.mrb[9].mxu1 }
 0x32f   : > { %v1855_v28 = vadd.f32 %v1854_v27, %v1853_v26 }
 0x331   : > { %v1567_v29 = vadd.f32 %v1855_v28, %v1497_v25 }
 0x333   : > { %v1571_v30 = vsel %vm1570_vm2, %v1567_v29, -inf }
 0x334   : > { %1572 = vmax.xlane.f32.xlu0 %v1571_v30 }
 0x3c1   : > { %v1573_v31 = vpop.xlane.xlu0 %1572 }
 0x3c2   : > { %v1574_v32 = vsub.f32 %v1567_v29, %v1573_v31 }
 0x3c4   : > { %v1575_v33 = vmul.f32 1.442695, %v1574_v32 }
 0x3c6   : > { %2210 = vpow2.f32 %v1575_v33 }
 0x3d0   : > { %v2211_v34 = vpop.eup %2210 }
 0x3d1   : > { %v1577_v35 = vsel %vm1570_vm2, %v2211_v34, 0.0 }
 0x3d2   : > { %1578 = vadd.xlane.f32.xlu0 %v1577_v35 }
 0x45f   : > { %v1579_v36 = vpop.xlane.xlu0 %1578 }
 0x460   : > { %2212 = vrcp.f32 %v1579_v36 }
 0x46a   : > { %v2213_v37 = vpop.eup %2212 }
 0x46b   : > { %v1581_v38 = vmul.f32 %v2213_v37, %v2211_v34 }
 0x46d   : > { %1582 = vst [vmem:[%s270_s9] sm:$0x1] %v1581_v38 }
 0x46e   : > { %2227 = shalt.err (!%p2224_p3)
}
 0x46f   : > { %s2228_s21 = scalar_lea.hbm %s3265_s16, 16  ;;  %s2232_s29 = scalar_lea.hbm %s3314_s7, 32 }
 0x470   : > { %p2229_p4 = scmp.ne.s32.totalorder %s3265_s16, %s2228_s21  ;;  %p2233_p9 = scmp.lt.u32.totalorder %s3265_s16, %s3314_s7 }
 0x471   : > { %p2234_p10 = scmp.lt.u32.totalorder %s2232_s29, %s2228_s21  ;;  %p2236_p12 = scmp.lt.u32.totalorder %s2228_s21, %s3265_s16 }
 0x472   : > { %p2230_p7 = pnand %p2229_p4, %p2358_p5 }
 0x473   : > { %p2235_p11 = por %p2234_p10, %p2233_p9 }
 0x474   : > { %p2231_p8 = pneg %p2230_p7 }
 0x475   : > { %p2237_p13 = por %p2236_p12, %p2235_p11 }
 0x477   : > { %p2238_p0 = pnand %p2237_p13, %p2231_p8 }
 0x479   : > { %2241 = shalt.err (!%p2238_p0)
}
 0x47a   : > { %2151 = dma.vmem_to_hbm [thread:$0]  (%p2358_p5), %s3267_s13, 16, %s3265_s16, %s1584_s17  }
 0x47b PF: > { %p2157_p1 = scmp.ge.s32.totalorder %s2276_s27, 2  ;;  %s1608_s14 = sand.u32 1, %s2264_s24  }
 0x47c   : > { %s1609_s15 = scalar_lea.sflag [#allocation3], %s1608_s14 }
 0x47d   : > { %p2154_p2 = pnand %p2157_p1, %p2362_p6 }
 0x47f   : > { %2259 = dma.done.wait (!%p2154_p2), %s1609_s15, 16  }
 0x480   : > { %2261 = vsyncadd (!%p2154_p2), %s1609_s15, 4294967280  ;;  %p17_p3 = scmp.ge.s32.totalorder %s2345_s30, 4   ;;  %s3317_s24 = smov %s2268_s25 }
 0x481   : > { %s3318_s25 = smov %s2272_s26  ;;  %s3319_s26 = smov %s2356_s10 }
 0x482   : > { %s3320_s27 = smov %s2345_s30  ;;  %19 = sbr.rel (!%p17_p3) target bundleno = 3 (0x3), region = 83 }
 0x489   :  { %1613 = vsyncpa [#allocation3], 1 }
 0x48a   :  { %1615 = vsyncpa [#allocation3 + $0x1], 1 }

</bundles_post_ra>
